<compile_context>
chip_gen: v7x
topology: tpu7x:2x2x1
jax: 0.10.0
libtpu: 0.0.40
codegen_flags: <defaults>
</compile_context>

<pallas_src>
import jax
import jax.numpy as jnp
import numpy as np
from jax.experimental import pallas as pl
from jax.experimental.pallas import tpu as pltpu


def _make_kernel(head_num: int):
    def kernel(seqs0_ref, keep_ref,
               wqkv_ref, aw1_ref, ab1_ref, aw2_ref, ab2_ref,
               lng_ref, lnb_ref, fw1_ref, fb1_ref, fw2_ref, fb2_ref,
               llng_ref, llnb_ref,
               o_ref, attn_ref):
        blk = pl.program_id(1)
        nblk = pl.num_programs(1)
        _, n, dim = o_ref.shape
        hd = dim // head_num
        scale = 1.0 / (hd ** 0.5)
        eps = 1e-8

        # ---- block 0: state := (log_seqs + pos_emb) * keep (precomputed in wrapper) ----
        @pl.when(blk == 0)
        def _init():
            o_ref[...] = seqs0_ref[...]

        x = o_ref[0]                               # (n, dim) f32 carried state
        keep = keep_ref[0]                         # (n, 1)   f32

        # ---- causal additive mask, built in-kernel ----
        row = jax.lax.broadcasted_iota(jnp.int32, (n, n), 0)
        col = jax.lax.broadcasted_iota(jnp.int32, (n, n), 1)
        amask = jnp.where(col <= row, 0.0, -1e9)

        # ---- fused QKV projection (bf16 operands, f32 accumulation) ----
        qkv = jnp.dot(x.astype(jnp.bfloat16), wqkv_ref[0],
                      preferred_element_type=jnp.float32)          # (n, 3*dim)

        # ---- multi-head attention: real head slices, per-head softmax ----
        # head_num is small & static; per-head temporaries die at the scratch
        # store, keeping vreg pressure low.
        for h in range(head_num):
            qh = qkv[:, h * hd:(h + 1) * hd]
            kh = qkv[:, dim + h * hd:dim + (h + 1) * hd]
            vh = qkv[:, 2 * dim + h * hd:2 * dim + (h + 1) * hd]
            sc = jax.lax.dot_general(
                qh, kh, (((1,), (1,)), ((), ())),
                preferred_element_type=jnp.float32) * scale + amask
            m = jnp.max(sc, axis=-1, keepdims=True)
            e = jnp.exp(sc - m)
            p = e * pl.reciprocal(jnp.sum(e, axis=-1, keepdims=True), approx=True)
            attn_ref[:, h * hd:(h + 1) * hd] = jnp.dot(
                p, vh, preferred_element_type=jnp.float32)
        attn = attn_ref[...]                        # (n, dim) f32

        # ---- attention FFN: Linear -> SiLU -> Linear ----
        h1 = jnp.dot(attn.astype(jnp.bfloat16), aw1_ref[0],
                     preferred_element_type=jnp.float32) + ab1_ref[0]
        h1 = h1 * jax.nn.sigmoid(h1)
        mha = jnp.dot(h1.astype(jnp.bfloat16), aw2_ref[0],
                      preferred_element_type=jnp.float32) + ab2_ref[0]

        # ---- residual + forward LayerNorm (f32) ----
        s = x + mha
        mu = jnp.mean(s, axis=-1, keepdims=True)
        var = jnp.mean((s - mu) ** 2, axis=-1, keepdims=True)
        s = (s - mu) * jax.lax.rsqrt(var + eps) * lng_ref[0] + lnb_ref[0]

        # ---- forward MLP: Linear -> ReLU -> Linear ----
        h2 = jnp.maximum(
            jnp.dot(s.astype(jnp.bfloat16), fw1_ref[0],
                    preferred_element_type=jnp.float32) + fb1_ref[0], 0.0)
        s = jnp.dot(h2.astype(jnp.bfloat16), fw2_ref[0],
                    preferred_element_type=jnp.float32) + fb2_ref[0]

        # ---- timeline mask ----
        s = s * keep

        @pl.when(blk < nblk - 1)
        def _store():
            o_ref[0] = s

        # ---- final LayerNorm after the last block ----
        @pl.when(blk == nblk - 1)
        def _final():
            mu_f = jnp.mean(s, axis=-1, keepdims=True)
            var_f = jnp.mean((s - mu_f) ** 2, axis=-1, keepdims=True)
            o_ref[0] = ((s - mu_f) * jax.lax.rsqrt(var_f + eps)
                        * llng_ref[...] + llnb_ref[...])

    return kernel


def log2feats_pallas(x, pos, keep_col, params, llng, llnb, *, head_num):
    bs, n, dim = x.shape
    blocks = params['wqkv'].shape[0]
    assert dim % head_num == 0

    # block-0 state computed on the XLA side; emb_dropout (p=0.5) is identity (eval).
    seqs0 = ((x + pos[None, :, :]) * keep_col).astype(jnp.float32)

    # bf16 weights for the native MXU path; biases / LayerNorm params stay f32.
    wqkv = params['wqkv'].astype(jnp.bfloat16)
    aw1 = params['aw1'].astype(jnp.bfloat16)
    aw2 = params['aw2'].astype(jnp.bfloat16)
    fw1 = params['fw1'].astype(jnp.bfloat16)
    fw2 = params['fw2'].astype(jnp.bfloat16)

    kernel = _make_kernel(head_num)

    def per_block_spec(shape):
        nd = len(shape)
        return pl.BlockSpec((1,) + shape[1:],
                            lambda i, b, _nd=nd: (b,) + (0,) * (_nd - 1))

    def full_spec(shape):
        nd = len(shape)
        return pl.BlockSpec(shape, lambda i, b, _nd=nd: (0,) * _nd)

    state_spec = pl.BlockSpec((1, n, dim), lambda i, b: (i, 0, 0))

    in_specs = [
        state_spec,                                        # seqs0 (aliased with output)
        pl.BlockSpec((1, n, 1), lambda i, b: (i, 0, 0)),   # keep (bs, n, 1)
        per_block_spec(wqkv.shape),
        per_block_spec(aw1.shape),
        per_block_spec(params['ab1'].shape),
        per_block_spec(aw2.shape),
        per_block_spec(params['ab2'].shape),
        per_block_spec(params['lng'].shape),
        per_block_spec(params['lnb'].shape),
        per_block_spec(fw1.shape),
        per_block_spec(params['fb1'].shape),
        per_block_spec(fw2.shape),
        per_block_spec(params['fb2'].shape),
        full_spec(llng.shape),
        full_spec(llnb.shape),
    ]
    out_spec = pl.BlockSpec((1, n, dim), lambda i, b: (i, 0, 0))

    return pl.pallas_call(
        kernel,
        out_shape=jax.ShapeDtypeStruct((bs, n, dim), jnp.float32),
        grid_spec=pltpu.PrefetchScalarGridSpec(
            num_scalar_prefetch=0,
            grid=(bs, blocks),
            in_specs=in_specs,
            out_specs=out_spec,
            scratch_shapes=[pltpu.VMEM((n, dim), jnp.float32)],
        ),
        compiler_params=pltpu.CompilerParams(
            dimension_semantics=("parallel", "arbitrary"),
            vmem_limit_bytes=32 * 1024 * 1024),
        input_output_aliases={0: 0},
    )(seqs0, keep_col, wqkv, aw1, params['ab1'], aw2, params['ab2'],
      params['lng'], params['lnb'], fw1, params['fb1'], fw2, params['fb2'],
      llng, llnb)


def log2feats_ref(x, pos, keep_col, params, llng, llnb, *, head_num):
    """Pure-JAX f32 reference mirroring the PyTorch forward (eval mode)."""
    bs, n, dim = x.shape
    hd = dim // head_num
    blocks = params['wqkv'].shape[0]
    tri = jnp.tril(jnp.ones((n, n), dtype=jnp.bool_))
    amask = jnp.where(tri, 0.0, -1e9).astype(jnp.float32)
    seqs = (x + pos[None]) * keep_col
    for b in range(blocks):
        qkv = seqs @ params['wqkv'][b]
        q, k, v = qkv[..., :dim], qkv[..., dim:2 * dim], qkv[..., 2 * dim:]
        q4 = q.reshape(bs, n, head_num, hd)
        k4 = k.reshape(bs, n, head_num, hd)
        v4 = v.reshape(bs, n, head_num, hd).transpose(0, 2, 1, 3)
        sc = jnp.einsum('bnhd,bmhd->bhnm', q4, k4) / (hd ** 0.5)
        sc = sc + amask[None, None]
        p = jax.nn.softmax(sc, axis=-1)
        out = jnp.einsum('bhnm,bhmd->bnhd', p, v4).reshape(bs, n, dim)
        h1 = out @ params['aw1'][b] + params['ab1'][b, 0]
        h1 = h1 * jax.nn.sigmoid(h1)
        mha = h1 @ params['aw2'][b] + params['ab2'][b, 0]
        seqs = seqs + mha
        mu = seqs.mean(-1, keepdims=True)
        var = ((seqs - mu) ** 2).mean(-1, keepdims=True)
        seqs = (seqs - mu) / jnp.sqrt(var + 1e-8) * params['lng'][b, 0] + params['lnb'][b, 0]
        h2 = jnp.maximum(seqs @ params['fw1'][b] + params['fb1'][b, 0], 0.0)
        seqs = h2 @ params['fw2'][b] + params['fb2'][b, 0]
        seqs = seqs * keep_col
    mu = seqs.mean(-1, keepdims=True)
    var = ((seqs - mu) ** 2).mean(-1, keepdims=True)
    return (seqs - mu) / jnp.sqrt(var + 1e-8) * llng[0] + llnb[0]


if __name__ == "__main__":
    bs, n, dim, blocks, head_num = 2, 16, 64, 2, 8
    hdim = 2 * dim

    key = jax.random.PRNGKey(0)
    ks = jax.random.split(key, 16)

    def nrm(k, shape, scale=0.1):
        return scale * jax.random.normal(k, shape, dtype=jnp.float32)

    # deterministic synthetic parameters (weights stored as (in_dim, out_dim))
    params = {
        'wqkv': nrm(ks[0], (blocks, dim, 3 * dim)),
        'aw1':  nrm(ks[3], (blocks, dim, hdim)),
        'ab1':  nrm(ks[4], (blocks, 1, hdim), 0.02),
        'aw2':  nrm(ks[5], (blocks, hdim, dim)),
        'ab2':  nrm(ks[6], (blocks, 1, dim), 0.02),
        'lng':  jnp.ones((blocks, 1, dim), jnp.float32),
        'lnb':  jnp.zeros((blocks, 1, dim), jnp.float32),
        'fw1':  nrm(ks[7], (blocks, dim, hdim)),
        'fb1':  nrm(ks[8], (blocks, 1, hdim), 0.02),
        'fw2':  nrm(ks[9], (blocks, hdim, dim)),
        'fb2':  nrm(ks[10], (blocks, 1, dim), 0.02),
    }
    llng = jnp.ones((1, dim), jnp.float32)
    llnb = jnp.zeros((1, dim), jnp.float32)

    # inputs: log_seqs is already-embedded (bs, n, dim); pos table gathered for
    # positions arange(n); timeline_mask (bs, n, 1) True = padding.
    x = jax.random.normal(ks[11], (bs, n, dim), dtype=jnp.float32)
    pos = nrm(ks[12], (n, dim), 0.5)
    lens = jnp.array([n, n // 2])
    timeline_mask = (jnp.arange(n)[None, :] >= lens[:, None])[:, :, None]   # (bs, n, 1)
    keep_col = (~timeline_mask).astype(jnp.float32)                          # (bs, n, 1)

    out = log2feats_pallas(x, pos, keep_col, params, llng, llnb,
                           head_num=head_num)
    out = jax.block_until_ready(out)

    with jax.default_matmul_precision("highest"):
        ref = jax.block_until_ready(
            log2feats_ref(x, pos, keep_col, params, llng, llnb,
                          head_num=head_num))

    # kernel uses bf16 MXU operands (f32 accumulation) vs an all-f32 reference.
    np.testing.assert_allclose(np.asarray(out), np.asarray(ref),
                               rtol=3e-2, atol=3e-2)
    assert out.shape == (bs, n, dim)
    print("KERNEL_OK")
</pallas_src>

<mosaic_0001>
module attributes {stable_mosaic.version = 11 : i64} {
  func.func @kernel(%arg0: i32, %arg1: i32, %arg2: memref<1x16x64xf32, #tpu.memory_space<vmem>>, %arg3: memref<1x16x1xf32, #tpu.memory_space<vmem>>, %arg4: memref<1x64x192xbf16, #tpu.memory_space<vmem>>, %arg5: memref<1x64x128xbf16, #tpu.memory_space<vmem>>, %arg6: memref<1x1x128xf32, #tpu.memory_space<vmem>>, %arg7: memref<1x128x64xbf16, #tpu.memory_space<vmem>>, %arg8: memref<1x1x64xf32, #tpu.memory_space<vmem>>, %arg9: memref<1x1x64xf32, #tpu.memory_space<vmem>>, %arg10: memref<1x1x64xf32, #tpu.memory_space<vmem>>, %arg11: memref<1x64x128xbf16, #tpu.memory_space<vmem>>, %arg12: memref<1x1x128xf32, #tpu.memory_space<vmem>>, %arg13: memref<1x128x64xbf16, #tpu.memory_space<vmem>>, %arg14: memref<1x1x64xf32, #tpu.memory_space<vmem>>, %arg15: memref<1x64xf32, #tpu.memory_space<vmem>>, %arg16: memref<1x64xf32, #tpu.memory_space<vmem>>, %arg17: memref<1x16x64xf32, #tpu.memory_space<vmem>>, %arg18: memref<16x64xf32, #tpu.memory_space<vmem>>) attributes {dimension_semantics = [#tpu.dimension_semantics<parallel>, #tpu.dimension_semantics<arbitrary>], iteration_bounds = array<i64: 2, 2>, scalar_prefetch = 0 : i64, scratch_operands = 1 : i64, tpu.core_type = #tpu.core_type<tc>, window_params = [{transform_indices = @transform_0, window_bounds = array<i64: 1, 16, 64>}, {transform_indices = @transform_1, window_bounds = array<i64: 1, 16, 1>}, {transform_indices = @transform_2, window_bounds = array<i64: 1, 64, 192>}, {transform_indices = @transform_3, window_bounds = array<i64: 1, 64, 128>}, {transform_indices = @transform_4, window_bounds = array<i64: 1, 1, 128>}, {transform_indices = @transform_5, window_bounds = array<i64: 1, 128, 64>}, {transform_indices = @transform_6, window_bounds = array<i64: 1, 1, 64>}, {transform_indices = @transform_7, window_bounds = array<i64: 1, 1, 64>}, {transform_indices = @transform_8, window_bounds = array<i64: 1, 1, 64>}, {transform_indices = @transform_9, window_bounds = array<i64: 1, 64, 128>}, {transform_indices = @transform_10, window_bounds = array<i64: 1, 1, 128>}, {transform_indices = @transform_11, window_bounds = array<i64: 1, 128, 64>}, {transform_indices = @transform_12, window_bounds = array<i64: 1, 1, 64>}, {pipeline_mode = #tpu.pipeline_mode<synchronous>, transform_indices = @transform_13, window_bounds = array<i64: 1, 64>}, {pipeline_mode = #tpu.pipeline_mode<synchronous>, transform_indices = @transform_14, window_bounds = array<i64: 1, 64>}, {transform_indices = @transform_15, window_bounds = array<i64: 1, 16, 64>}]} {
    %c0_i32 = arith.constant 0 : i32
    %0 = arith.cmpi eq, %arg1, %c0_i32 : i32
    %1 = arith.extui %0 : i1 to i32
    %c0_i32_0 = arith.constant 0 : i32
    %2 = arith.cmpi ne, %1, %c0_i32_0 : i32
    scf.if %2 {
      %c0_106 = arith.constant 0 : index
      %c0_107 = arith.constant 0 : index
      %c0_108 = arith.constant 0 : index
      %245 = vector.load %arg2[%c0_106, %c0_107, %c0_108] : memref<1x16x64xf32, #tpu.memory_space<vmem>>, vector<1x16x64xf32>
      %c0_109 = arith.constant 0 : index
      %c0_110 = arith.constant 0 : index
      %c0_111 = arith.constant 0 : index
      %246 = vector.load %arg17[%c0_109, %c0_110, %c0_111] : memref<1x16x64xf32, #tpu.memory_space<vmem>>, vector<1x16x64xf32>
      tpu.vector_store %arg17[%c0_109, %c0_110, %c0_111], %245 {strides = array<i32>} : memref<1x16x64xf32, #tpu.memory_space<vmem>>, vector<1x16x64xf32>,
    } else {
    }
    %c0 = arith.constant 0 : index
    %c0_1 = arith.constant 0 : index
    %c0_2 = arith.constant 0 : index
    %3 = vector.load %arg17[%c0, %c0_1, %c0_2] : memref<1x16x64xf32, #tpu.memory_space<vmem>>, vector<1x16x64xf32>
    %4 = vector.shape_cast %3 : vector<1x16x64xf32> to vector<16x64xf32>
    %c0_3 = arith.constant 0 : index
    %c0_4 = arith.constant 0 : index
    %c0_5 = arith.constant 0 : index
    %5 = vector.load %arg3[%c0_3, %c0_4, %c0_5] : memref<1x16x1xf32, #tpu.memory_space<vmem>>, vector<1x16x1xf32>
    %6 = vector.shape_cast %5 : vector<1x16x1xf32> to vector<16x1xf32>
    %7 = tpu.iota {dimensions = array<i32: 0>} : vector<16x16xi32>
    %8 = tpu.iota {dimensions = array<i32: 1>} : vector<16x16xi32>
    %9 = arith.cmpi sle, %8, %7 : vector<16x16xi32>
    %cst = arith.constant 0.000000e+00 : f32
    %cst_6 = arith.constant -1.000000e+09 : f32
    %10 = vector.broadcast %cst : f32 to vector<16x16xf32>
    %11 = vector.broadcast %cst_6 : f32 to vector<16x16xf32>
    %12 = arith.select %9, %10, %11 : vector<16x16xi1>, vector<16x16xf32>
    %13 = arith.truncf %4 : vector<16x64xf32> to vector<16x64xbf16>
    %c0_7 = arith.constant 0 : index
    %c0_8 = arith.constant 0 : index
    %c0_9 = arith.constant 0 : index
    %14 = vector.load %arg4[%c0_7, %c0_8, %c0_9] : memref<1x64x192xbf16, #tpu.memory_space<vmem>>, vector<1x64x192xbf16>
    %15 = vector.shape_cast %14 : vector<1x64x192xbf16> to vector<64x192xbf16>
    %cst_10 = arith.constant dense<0.000000e+00> : vector<16x192xf32>
    %16 = tpu.matmul %13, %15, %cst_10 {dimension_numbers = #tpu.dot_dimension_numbers<[1], [0], [0], [1], [0, 0, 1, 1], [], []>} : vector<16x64xbf16>, vector<64x192xbf16>, vector<16x192xf32> -> vector<16x192xf32>
    %17 = vector.extract_strided_slice %16 {offsets = [0, 0], sizes = [16, 8], strides = [1, 1]} : vector<16x192xf32> to vector<16x8xf32>
    %18 = vector.extract_strided_slice %16 {offsets = [0, 64], sizes = [16, 8], strides = [1, 1]} : vector<16x192xf32> to vector<16x8xf32>
    %19 = vector.extract_strided_slice %16 {offsets = [0, 128], sizes = [16, 8], strides = [1, 1]} : vector<16x192xf32> to vector<16x8xf32>
    %cst_11 = arith.constant dense<0.000000e+00> : vector<16x16xf32>
    %20 = tpu.matmul %17, %18, %cst_11 {dimension_numbers = #tpu.dot_dimension_numbers<[1], [1], [0], [0], [0, 0, 1, 0], [], []>} : vector<16x8xf32>, vector<16x8xf32>, vector<16x16xf32> -> vector<16x16xf32>
    %cst_12 = arith.constant 0.353553385 : f32
    %21 = vector.broadcast %cst_12 : f32 to vector<16x16xf32>
    %22 = arith.mulf %20, %21 : vector<16x16xf32>
    %23 = arith.addf %22, %12 : vector<16x16xf32>
    %cst_13 = arith.constant dense<0xFF800000> : vector<16xf32>
    %24 = vector.multi_reduction <maximumf>, %23, %cst_13 [1] : vector<16x16xf32> to vector<16xf32>
    %25 = vector.shape_cast %24 : vector<16xf32> to vector<16x1xf32>
    %26 = vector.broadcast %25 : vector<16x1xf32> to vector<16x16xf32>
    %27 = arith.subf %23, %26 : vector<16x16xf32>
    %28 = math.exp %27 : vector<16x16xf32>
    %cst_14 = arith.constant dense<0.000000e+00> : vector<16xf32>
    %29 = vector.multi_reduction <add>, %28, %cst_14 [1] : vector<16x16xf32> to vector<16xf32>
    %30 = vector.shape_cast %29 : vector<16xf32> to vector<16x1xf32>
    %31 = tpu.reciprocal %30 {approx = true} : vector<16x1xf32> -> vector<16x1xf32>
    %32 = vector.broadcast %31 : vector<16x1xf32> to vector<16x16xf32>
    %33 = arith.mulf %28, %32 : vector<16x16xf32>
    %cst_15 = arith.constant dense<0.000000e+00> : vector<16x8xf32>
    %34 = tpu.matmul %33, %19, %cst_15 {dimension_numbers = #tpu.dot_dimension_numbers<[1], [0], [0], [1], [0, 0, 1, 1], [], []>} : vector<16x16xf32>, vector<16x8xf32>, vector<16x8xf32> -> vector<16x8xf32>
    %c0_16 = arith.constant 0 : index
    %c0_17 = arith.constant 0 : index
    %35 = vector.load %arg18[%c0_16, %c0_17] : memref<16x64xf32, #tpu.memory_space<vmem>>, vector<16x8xf32>
    tpu.vector_store %arg18[%c0_16, %c0_17], %34 {strides = array<i32>} : memref<16x64xf32, #tpu.memory_space<vmem>>, vector<16x8xf32>,
    %36 = vector.extract_strided_slice %16 {offsets = [0, 8], sizes = [16, 8], strides = [1, 1]} : vector<16x192xf32> to vector<16x8xf32>
    %37 = vector.extract_strided_slice %16 {offsets = [0, 72], sizes = [16, 8], strides = [1, 1]} : vector<16x192xf32> to vector<16x8xf32>
    %38 = vector.extract_strided_slice %16 {offsets = [0, 136], sizes = [16, 8], strides = [1, 1]} : vector<16x192xf32> to vector<16x8xf32>
    %cst_18 = arith.constant dense<0.000000e+00> : vector<16x16xf32>
    %39 = tpu.matmul %36, %37, %cst_18 {dimension_numbers = #tpu.dot_dimension_numbers<[1], [1], [0], [0], [0, 0, 1, 0], [], []>} : vector<16x8xf32>, vector<16x8xf32>, vector<16x16xf32> -> vector<16x16xf32>
    %cst_19 = arith.constant 0.353553385 : f32
    %40 = vector.broadcast %cst_19 : f32 to vector<16x16xf32>
    %41 = arith.mulf %39, %40 : vector<16x16xf32>
    %42 = arith.addf %41, %12 : vector<16x16xf32>
    %cst_20 = arith.constant dense<0xFF800000> : vector<16xf32>
    %43 = vector.multi_reduction <maximumf>, %42, %cst_20 [1] : vector<16x16xf32> to vector<16xf32>
    %44 = vector.shape_cast %43 : vector<16xf32> to vector<16x1xf32>
    %45 = vector.broadcast %44 : vector<16x1xf32> to vector<16x16xf32>
    %46 = arith.subf %42, %45 : vector<16x16xf32>
    %47 = math.exp %46 : vector<16x16xf32>
    %cst_21 = arith.constant dense<0.000000e+00> : vector<16xf32>
    %48 = vector.multi_reduction <add>, %47, %cst_21 [1] : vector<16x16xf32> to vector<16xf32>
    %49 = vector.shape_cast %48 : vector<16xf32> to vector<16x1xf32>
    %50 = tpu.reciprocal %49 {approx = true} : vector<16x1xf32> -> vector<16x1xf32>
    %51 = vector.broadcast %50 : vector<16x1xf32> to vector<16x16xf32>
    %52 = arith.mulf %47, %51 : vector<16x16xf32>
    %cst_22 = arith.constant dense<0.000000e+00> : vector<16x8xf32>
    %53 = tpu.matmul %52, %38, %cst_22 {dimension_numbers = #tpu.dot_dimension_numbers<[1], [0], [0], [1], [0, 0, 1, 1], [], []>} : vector<16x16xf32>, vector<16x8xf32>, vector<16x8xf32> -> vector<16x8xf32>
    %c0_23 = arith.constant 0 : index
    %c8 = arith.constant 8 : index
    %54 = vector.load %arg18[%c0_23, %c8] : memref<16x64xf32, #tpu.memory_space<vmem>>, vector<16x8xf32>
    tpu.vector_store %arg18[%c0_23, %c8], %53 {strides = array<i32>} : memref<16x64xf32, #tpu.memory_space<vmem>>, vector<16x8xf32>,
    %55 = vector.extract_strided_slice %16 {offsets = [0, 16], sizes = [16, 8], strides = [1, 1]} : vector<16x192xf32> to vector<16x8xf32>
    %56 = vector.extract_strided_slice %16 {offsets = [0, 80], sizes = [16, 8], strides = [1, 1]} : vector<16x192xf32> to vector<16x8xf32>
    %57 = vector.extract_strided_slice %16 {offsets = [0, 144], sizes = [16, 8], strides = [1, 1]} : vector<16x192xf32> to vector<16x8xf32>
    %cst_24 = arith.constant dense<0.000000e+00> : vector<16x16xf32>
    %58 = tpu.matmul %55, %56, %cst_24 {dimension_numbers = #tpu.dot_dimension_numbers<[1], [1], [0], [0], [0, 0, 1, 0], [], []>} : vector<16x8xf32>, vector<16x8xf32>, vector<16x16xf32> -> vector<16x16xf32>
    %cst_25 = arith.constant 0.353553385 : f32
    %59 = vector.broadcast %cst_25 : f32 to vector<16x16xf32>
    %60 = arith.mulf %58, %59 : vector<16x16xf32>
    %61 = arith.addf %60, %12 : vector<16x16xf32>
    %cst_26 = arith.constant dense<0xFF800000> : vector<16xf32>
    %62 = vector.multi_reduction <maximumf>, %61, %cst_26 [1] : vector<16x16xf32> to vector<16xf32>
    %63 = vector.shape_cast %62 : vector<16xf32> to vector<16x1xf32>
    %64 = vector.broadcast %63 : vector<16x1xf32> to vector<16x16xf32>
    %65 = arith.subf %61, %64 : vector<16x16xf32>
    %66 = math.exp %65 : vector<16x16xf32>
    %cst_27 = arith.constant dense<0.000000e+00> : vector<16xf32>
    %67 = vector.multi_reduction <add>, %66, %cst_27 [1] : vector<16x16xf32> to vector<16xf32>
    %68 = vector.shape_cast %67 : vector<16xf32> to vector<16x1xf32>
    %69 = tpu.reciprocal %68 {approx = true} : vector<16x1xf32> -> vector<16x1xf32>
    %70 = vector.broadcast %69 : vector<16x1xf32> to vector<16x16xf32>
    %71 = arith.mulf %66, %70 : vector<16x16xf32>
    %cst_28 = arith.constant dense<0.000000e+00> : vector<16x8xf32>
    %72 = tpu.matmul %71, %57, %cst_28 {dimension_numbers = #tpu.dot_dimension_numbers<[1], [0], [0], [1], [0, 0, 1, 1], [], []>} : vector<16x16xf32>, vector<16x8xf32>, vector<16x8xf32> -> vector<16x8xf32>
    %c0_29 = arith.constant 0 : index
    %c16 = arith.constant 16 : index
    %73 = vector.load %arg18[%c0_29, %c16] : memref<16x64xf32, #tpu.memory_space<vmem>>, vector<16x8xf32>
    tpu.vector_store %arg18[%c0_29, %c16], %72 {strides = array<i32>} : memref<16x64xf32, #tpu.memory_space<vmem>>, vector<16x8xf32>,
    %74 = vector.extract_strided_slice %16 {offsets = [0, 24], sizes = [16, 8], strides = [1, 1]} : vector<16x192xf32> to vector<16x8xf32>
    %75 = vector.extract_strided_slice %16 {offsets = [0, 88], sizes = [16, 8], strides = [1, 1]} : vector<16x192xf32> to vector<16x8xf32>
    %76 = vector.extract_strided_slice %16 {offsets = [0, 152], sizes = [16, 8], strides = [1, 1]} : vector<16x192xf32> to vector<16x8xf32>
    %cst_30 = arith.constant dense<0.000000e+00> : vector<16x16xf32>
    %77 = tpu.matmul %74, %75, %cst_30 {dimension_numbers = #tpu.dot_dimension_numbers<[1], [1], [0], [0], [0, 0, 1, 0], [], []>} : vector<16x8xf32>, vector<16x8xf32>, vector<16x16xf32> -> vector<16x16xf32>
    %cst_31 = arith.constant 0.353553385 : f32
    %78 = vector.broadcast %cst_31 : f32 to vector<16x16xf32>
    %79 = arith.mulf %77, %78 : vector<16x16xf32>
    %80 = arith.addf %79, %12 : vector<16x16xf32>
    %cst_32 = arith.constant dense<0xFF800000> : vector<16xf32>
    %81 = vector.multi_reduction <maximumf>, %80, %cst_32 [1] : vector<16x16xf32> to vector<16xf32>
    %82 = vector.shape_cast %81 : vector<16xf32> to vector<16x1xf32>
    %83 = vector.broadcast %82 : vector<16x1xf32> to vector<16x16xf32>
    %84 = arith.subf %80, %83 : vector<16x16xf32>
    %85 = math.exp %84 : vector<16x16xf32>
    %cst_33 = arith.constant dense<0.000000e+00> : vector<16xf32>
    %86 = vector.multi_reduction <add>, %85, %cst_33 [1] : vector<16x16xf32> to vector<16xf32>
    %87 = vector.shape_cast %86 : vector<16xf32> to vector<16x1xf32>
    %88 = tpu.reciprocal %87 {approx = true} : vector<16x1xf32> -> vector<16x1xf32>
    %89 = vector.broadcast %88 : vector<16x1xf32> to vector<16x16xf32>
    %90 = arith.mulf %85, %89 : vector<16x16xf32>
    %cst_34 = arith.constant dense<0.000000e+00> : vector<16x8xf32>
    %91 = tpu.matmul %90, %76, %cst_34 {dimension_numbers = #tpu.dot_dimension_numbers<[1], [0], [0], [1], [0, 0, 1, 1], [], []>} : vector<16x16xf32>, vector<16x8xf32>, vector<16x8xf32> -> vector<16x8xf32>
    %c0_35 = arith.constant 0 : index
    %c24 = arith.constant 24 : index
    %92 = vector.load %arg18[%c0_35, %c24] : memref<16x64xf32, #tpu.memory_space<vmem>>, vector<16x8xf32>
    tpu.vector_store %arg18[%c0_35, %c24], %91 {strides = array<i32>} : memref<16x64xf32, #tpu.memory_space<vmem>>, vector<16x8xf32>,
    %93 = vector.extract_strided_slice %16 {offsets = [0, 32], sizes = [16, 8], strides = [1, 1]} : vector<16x192xf32> to vector<16x8xf32>
    %94 = vector.extract_strided_slice %16 {offsets = [0, 96], sizes = [16, 8], strides = [1, 1]} : vector<16x192xf32> to vector<16x8xf32>
    %95 = vector.extract_strided_slice %16 {offsets = [0, 160], sizes = [16, 8], strides = [1, 1]} : vector<16x192xf32> to vector<16x8xf32>
    %cst_36 = arith.constant dense<0.000000e+00> : vector<16x16xf32>
    %96 = tpu.matmul %93, %94, %cst_36 {dimension_numbers = #tpu.dot_dimension_numbers<[1], [1], [0], [0], [0, 0, 1, 0], [], []>} : vector<16x8xf32>, vector<16x8xf32>, vector<16x16xf32> -> vector<16x16xf32>
    %cst_37 = arith.constant 0.353553385 : f32
    %97 = vector.broadcast %cst_37 : f32 to vector<16x16xf32>
    %98 = arith.mulf %96, %97 : vector<16x16xf32>
    %99 = arith.addf %98, %12 : vector<16x16xf32>
    %cst_38 = arith.constant dense<0xFF800000> : vector<16xf32>
    %100 = vector.multi_reduction <maximumf>, %99, %cst_38 [1] : vector<16x16xf32> to vector<16xf32>
    %101 = vector.shape_cast %100 : vector<16xf32> to vector<16x1xf32>
    %102 = vector.broadcast %101 : vector<16x1xf32> to vector<16x16xf32>
    %103 = arith.subf %99, %102 : vector<16x16xf32>
    %104 = math.exp %103 : vector<16x16xf32>
    %cst_39 = arith.constant dense<0.000000e+00> : vector<16xf32>
    %105 = vector.multi_reduction <add>, %104, %cst_39 [1] : vector<16x16xf32> to vector<16xf32>
    %106 = vector.shape_cast %105 : vector<16xf32> to vector<16x1xf32>
    %107 = tpu.reciprocal %106 {approx = true} : vector<16x1xf32> -> vector<16x1xf32>
    %108 = vector.broadcast %107 : vector<16x1xf32> to vector<16x16xf32>
    %109 = arith.mulf %104, %108 : vector<16x16xf32>
    %cst_40 = arith.constant dense<0.000000e+00> : vector<16x8xf32>
    %110 = tpu.matmul %109, %95, %cst_40 {dimension_numbers = #tpu.dot_dimension_numbers<[1], [0], [0], [1], [0, 0, 1, 1], [], []>} : vector<16x16xf32>, vector<16x8xf32>, vector<16x8xf32> -> vector<16x8xf32>
    %c0_41 = arith.constant 0 : index
    %c32 = arith.constant 32 : index
    %111 = vector.load %arg18[%c0_41, %c32] : memref<16x64xf32, #tpu.memory_space<vmem>>, vector<16x8xf32>
    tpu.vector_store %arg18[%c0_41, %c32], %110 {strides = array<i32>} : memref<16x64xf32, #tpu.memory_space<vmem>>, vector<16x8xf32>,
    %112 = vector.extract_strided_slice %16 {offsets = [0, 40], sizes = [16, 8], strides = [1, 1]} : vector<16x192xf32> to vector<16x8xf32>
    %113 = vector.extract_strided_slice %16 {offsets = [0, 104], sizes = [16, 8], strides = [1, 1]} : vector<16x192xf32> to vector<16x8xf32>
    %114 = vector.extract_strided_slice %16 {offsets = [0, 168], sizes = [16, 8], strides = [1, 1]} : vector<16x192xf32> to vector<16x8xf32>
    %cst_42 = arith.constant dense<0.000000e+00> : vector<16x16xf32>
    %115 = tpu.matmul %112, %113, %cst_42 {dimension_numbers = #tpu.dot_dimension_numbers<[1], [1], [0], [0], [0, 0, 1, 0], [], []>} : vector<16x8xf32>, vector<16x8xf32>, vector<16x16xf32> -> vector<16x16xf32>
    %cst_43 = arith.constant 0.353553385 : f32
    %116 = vector.broadcast %cst_43 : f32 to vector<16x16xf32>
    %117 = arith.mulf %115, %116 : vector<16x16xf32>
    %118 = arith.addf %117, %12 : vector<16x16xf32>
    %cst_44 = arith.constant dense<0xFF800000> : vector<16xf32>
    %119 = vector.multi_reduction <maximumf>, %118, %cst_44 [1] : vector<16x16xf32> to vector<16xf32>
    %120 = vector.shape_cast %119 : vector<16xf32> to vector<16x1xf32>
    %121 = vector.broadcast %120 : vector<16x1xf32> to vector<16x16xf32>
    %122 = arith.subf %118, %121 : vector<16x16xf32>
    %123 = math.exp %122 : vector<16x16xf32>
    %cst_45 = arith.constant dense<0.000000e+00> : vector<16xf32>
    %124 = vector.multi_reduction <add>, %123, %cst_45 [1] : vector<16x16xf32> to vector<16xf32>
    %125 = vector.shape_cast %124 : vector<16xf32> to vector<16x1xf32>
    %126 = tpu.reciprocal %125 {approx = true} : vector<16x1xf32> -> vector<16x1xf32>
    %127 = vector.broadcast %126 : vector<16x1xf32> to vector<16x16xf32>
    %128 = arith.mulf %123, %127 : vector<16x16xf32>
    %cst_46 = arith.constant dense<0.000000e+00> : vector<16x8xf32>
    %129 = tpu.matmul %128, %114, %cst_46 {dimension_numbers = #tpu.dot_dimension_numbers<[1], [0], [0], [1], [0, 0, 1, 1], [], []>} : vector<16x16xf32>, vector<16x8xf32>, vector<16x8xf32> -> vector<16x8xf32>
    %c0_47 = arith.constant 0 : index
    %c40 = arith.constant 40 : index
    %130 = vector.load %arg18[%c0_47, %c40] : memref<16x64xf32, #tpu.memory_space<vmem>>, vector<16x8xf32>
    tpu.vector_store %arg18[%c0_47, %c40], %129 {strides = array<i32>} : memref<16x64xf32, #tpu.memory_space<vmem>>, vector<16x8xf32>,
    %131 = vector.extract_strided_slice %16 {offsets = [0, 48], sizes = [16, 8], strides = [1, 1]} : vector<16x192xf32> to vector<16x8xf32>
    %132 = vector.extract_strided_slice %16 {offsets = [0, 112], sizes = [16, 8], strides = [1, 1]} : vector<16x192xf32> to vector<16x8xf32>
    %133 = vector.extract_strided_slice %16 {offsets = [0, 176], sizes = [16, 8], strides = [1, 1]} : vector<16x192xf32> to vector<16x8xf32>
    %cst_48 = arith.constant dense<0.000000e+00> : vector<16x16xf32>
    %134 = tpu.matmul %131, %132, %cst_48 {dimension_numbers = #tpu.dot_dimension_numbers<[1], [1], [0], [0], [0, 0, 1, 0], [], []>} : vector<16x8xf32>, vector<16x8xf32>, vector<16x16xf32> -> vector<16x16xf32>
    %cst_49 = arith.constant 0.353553385 : f32
    %135 = vector.broadcast %cst_49 : f32 to vector<16x16xf32>
    %136 = arith.mulf %134, %135 : vector<16x16xf32>
    %137 = arith.addf %136, %12 : vector<16x16xf32>
    %cst_50 = arith.constant dense<0xFF800000> : vector<16xf32>
    %138 = vector.multi_reduction <maximumf>, %137, %cst_50 [1] : vector<16x16xf32> to vector<16xf32>
    %139 = vector.shape_cast %138 : vector<16xf32> to vector<16x1xf32>
    %140 = vector.broadcast %139 : vector<16x1xf32> to vector<16x16xf32>
    %141 = arith.subf %137, %140 : vector<16x16xf32>
    %142 = math.exp %141 : vector<16x16xf32>
    %cst_51 = arith.constant dense<0.000000e+00> : vector<16xf32>
    %143 = vector.multi_reduction <add>, %142, %cst_51 [1] : vector<16x16xf32> to vector<16xf32>
    %144 = vector.shape_cast %143 : vector<16xf32> to vector<16x1xf32>
    %145 = tpu.reciprocal %144 {approx = true} : vector<16x1xf32> -> vector<16x1xf32>
    %146 = vector.broadcast %145 : vector<16x1xf32> to vector<16x16xf32>
    %147 = arith.mulf %142, %146 : vector<16x16xf32>
    %cst_52 = arith.constant dense<0.000000e+00> : vector<16x8xf32>
    %148 = tpu.matmul %147, %133, %cst_52 {dimension_numbers = #tpu.dot_dimension_numbers<[1], [0], [0], [1], [0, 0, 1, 1], [], []>} : vector<16x16xf32>, vector<16x8xf32>, vector<16x8xf32> -> vector<16x8xf32>
    %c0_53 = arith.constant 0 : index
    %c48 = arith.constant 48 : index
    %149 = vector.load %arg18[%c0_53, %c48] : memref<16x64xf32, #tpu.memory_space<vmem>>, vector<16x8xf32>
    tpu.vector_store %arg18[%c0_53, %c48], %148 {strides = array<i32>} : memref<16x64xf32, #tpu.memory_space<vmem>>, vector<16x8xf32>,
    %150 = vector.extract_strided_slice %16 {offsets = [0, 56], sizes = [16, 8], strides = [1, 1]} : vector<16x192xf32> to vector<16x8xf32>
    %151 = vector.extract_strided_slice %16 {offsets = [0, 120], sizes = [16, 8], strides = [1, 1]} : vector<16x192xf32> to vector<16x8xf32>
    %152 = vector.extract_strided_slice %16 {offsets = [0, 184], sizes = [16, 8], strides = [1, 1]} : vector<16x192xf32> to vector<16x8xf32>
    %cst_54 = arith.constant dense<0.000000e+00> : vector<16x16xf32>
    %153 = tpu.matmul %150, %151, %cst_54 {dimension_numbers = #tpu.dot_dimension_numbers<[1], [1], [0], [0], [0, 0, 1, 0], [], []>} : vector<16x8xf32>, vector<16x8xf32>, vector<16x16xf32> -> vector<16x16xf32>
    %cst_55 = arith.constant 0.353553385 : f32
    %154 = vector.broadcast %cst_55 : f32 to vector<16x16xf32>
    %155 = arith.mulf %153, %154 : vector<16x16xf32>
    %156 = arith.addf %155, %12 : vector<16x16xf32>
    %cst_56 = arith.constant dense<0xFF800000> : vector<16xf32>
    %157 = vector.multi_reduction <maximumf>, %156, %cst_56 [1] : vector<16x16xf32> to vector<16xf32>
    %158 = vector.shape_cast %157 : vector<16xf32> to vector<16x1xf32>
    %159 = vector.broadcast %158 : vector<16x1xf32> to vector<16x16xf32>
    %160 = arith.subf %156, %159 : vector<16x16xf32>
    %161 = math.exp %160 : vector<16x16xf32>
    %cst_57 = arith.constant dense<0.000000e+00> : vector<16xf32>
    %162 = vector.multi_reduction <add>, %161, %cst_57 [1] : vector<16x16xf32> to vector<16xf32>
    %163 = vector.shape_cast %162 : vector<16xf32> to vector<16x1xf32>
    %164 = tpu.reciprocal %163 {approx = true} : vector<16x1xf32> -> vector<16x1xf32>
    %165 = vector.broadcast %164 : vector<16x1xf32> to vector<16x16xf32>
    %166 = arith.mulf %161, %165 : vector<16x16xf32>
    %cst_58 = arith.constant dense<0.000000e+00> : vector<16x8xf32>
    %167 = tpu.matmul %166, %152, %cst_58 {dimension_numbers = #tpu.dot_dimension_numbers<[1], [0], [0], [1], [0, 0, 1, 1], [], []>} : vector<16x16xf32>, vector<16x8xf32>, vector<16x8xf32> -> vector<16x8xf32>
    %c0_59 = arith.constant 0 : index
    %c56 = arith.constant 56 : index
    %168 = vector.load %arg18[%c0_59, %c56] : memref<16x64xf32, #tpu.memory_space<vmem>>, vector<16x8xf32>
    tpu.vector_store %arg18[%c0_59, %c56], %167 {strides = array<i32>} : memref<16x64xf32, #tpu.memory_space<vmem>>, vector<16x8xf32>,
    %c0_60 = arith.constant 0 : index
    %c0_61 = arith.constant 0 : index
    %169 = vector.load %arg18[%c0_60, %c0_61] : memref<16x64xf32, #tpu.memory_space<vmem>>, vector<16x64xf32>
    %170 = arith.truncf %169 : vector<16x64xf32> to vector<16x64xbf16>
    %c0_62 = arith.constant 0 : index
    %c0_63 = arith.constant 0 : index
    %c0_64 = arith.constant 0 : index
    %171 = vector.load %arg5[%c0_62, %c0_63, %c0_64] : memref<1x64x128xbf16, #tpu.memory_space<vmem>>, vector<1x64x128xbf16>
    %172 = vector.shape_cast %171 : vector<1x64x128xbf16> to vector<64x128xbf16>
    %cst_65 = arith.constant dense<0.000000e+00> : vector<16x128xf32>
    %173 = tpu.matmul %170, %172, %cst_65 {dimension_numbers = #tpu.dot_dimension_numbers<[1], [0], [0], [1], [0, 0, 1, 1], [], []>} : vector<16x64xbf16>, vector<64x128xbf16>, vector<16x128xf32> -> vector<16x128xf32>
    %c0_66 = arith.constant 0 : index
    %c0_67 = arith.constant 0 : index
    %c0_68 = arith.constant 0 : index
    %174 = vector.load %arg6[%c0_66, %c0_67, %c0_68] : memref<1x1x128xf32, #tpu.memory_space<vmem>>, vector<1x1x128xf32>
    %175 = vector.shape_cast %174 : vector<1x1x128xf32> to vector<1x128xf32>
    %176 = vector.broadcast %175 : vector<1x128xf32> to vector<16x128xf32>
    %177 = arith.addf %173, %176 : vector<16x128xf32>
    %178 = arith.negf %177 : vector<16x128xf32>
    %179 = math.exp %178 : vector<16x128xf32>
    %cst_69 = arith.constant 1.000000e+00 : f32
    %180 = vector.broadcast %cst_69 : f32 to vector<16x128xf32>
    %181 = arith.addf %180, %179 : vector<16x128xf32>
    %182 = arith.divf %180, %181 : vector<16x128xf32>
    %183 = arith.mulf %177, %182 : vector<16x128xf32>
    %184 = arith.truncf %183 : vector<16x128xf32> to vector<16x128xbf16>
    %c0_70 = arith.constant 0 : index
    %c0_71 = arith.constant 0 : index
    %c0_72 = arith.constant 0 : index
    %185 = vector.load %arg7[%c0_70, %c0_71, %c0_72] : memref<1x128x64xbf16, #tpu.memory_space<vmem>>, vector<1x128x64xbf16>
    %186 = vector.shape_cast %185 : vector<1x128x64xbf16> to vector<128x64xbf16>
    %cst_73 = arith.constant dense<0.000000e+00> : vector<16x64xf32>
    %187 = tpu.matmul %184, %186, %cst_73 {dimension_numbers = #tpu.dot_dimension_numbers<[1], [0], [0], [1], [0, 0, 1, 1], [], []>} : vector<16x128xbf16>, vector<128x64xbf16>, vector<16x64xf32> -> vector<16x64xf32>
    %c0_74 = arith.constant 0 : index
    %c0_75 = arith.constant 0 : index
    %c0_76 = arith.constant 0 : index
    %188 = vector.load %arg8[%c0_74, %c0_75, %c0_76] : memref<1x1x64xf32, #tpu.memory_space<vmem>>, vector<1x1x64xf32>
    %189 = vector.shape_cast %188 : vector<1x1x64xf32> to vector<1x64xf32>
    %190 = vector.broadcast %189 : vector<1x64xf32> to vector<16x64xf32>
    %191 = arith.addf %187, %190 : vector<16x64xf32>
    %192 = arith.addf %4, %191 : vector<16x64xf32>
    %cst_77 = arith.constant dense<0.000000e+00> : vector<16xf32>
    %193 = vector.multi_reduction <add>, %192, %cst_77 [1] : vector<16x64xf32> to vector<16xf32>
    %194 = vector.shape_cast %193 : vector<16xf32> to vector<16x1xf32>
    %cst_78 = arith.constant 6.400000e+01 : f32
    %195 = vector.broadcast %cst_78 : f32 to vector<16x1xf32>
    %196 = arith.divf %194, %195 : vector<16x1xf32>
    %197 = vector.broadcast %196 : vector<16x1xf32> to vector<16x64xf32>
    %198 = arith.subf %192, %197 : vector<16x64xf32>
    %199 = arith.mulf %198, %198 : vector<16x64xf32>
    %cst_79 = arith.constant dense<0.000000e+00> : vector<16xf32>
    %200 = vector.multi_reduction <add>, %199, %cst_79 [1] : vector<16x64xf32> to vector<16xf32>
    %201 = vector.shape_cast %200 : vector<16xf32> to vector<16x1xf32>
    %cst_80 = arith.constant 6.400000e+01 : f32
    %202 = vector.broadcast %cst_80 : f32 to vector<16x1xf32>
    %203 = arith.divf %201, %202 : vector<16x1xf32>
    %204 = vector.broadcast %196 : vector<16x1xf32> to vector<16x64xf32>
    %205 = arith.subf %192, %204 : vector<16x64xf32>
    %cst_81 = arith.constant 9.99999993E-9 : f32
    %206 = vector.broadcast %cst_81 : f32 to vector<16x1xf32>
    %207 = arith.addf %203, %206 : vector<16x1xf32>
    %208 = math.rsqrt %207 : vector<16x1xf32>
    %209 = vector.broadcast %208 : vector<16x1xf32> to vector<16x64xf32>
    %210 = arith.mulf %205, %209 : vector<16x64xf32>
    %c0_82 = arith.constant 0 : index
    %c0_83 = arith.constant 0 : index
    %c0_84 = arith.constant 0 : index
    %211 = vector.load %arg9[%c0_82, %c0_83, %c0_84] : memref<1x1x64xf32, #tpu.memory_space<vmem>>, vector<1x1x64xf32>
    %212 = vector.shape_cast %211 : vector<1x1x64xf32> to vector<1x64xf32>
    %213 = vector.broadcast %212 : vector<1x64xf32> to vector<16x64xf32>
    %214 = arith.mulf %210, %213 : vector<16x64xf32>
    %c0_85 = arith.constant 0 : index
    %c0_86 = arith.constant 0 : index
    %c0_87 = arith.constant 0 : index
    %215 = vector.load %arg10[%c0_85, %c0_86, %c0_87] : memref<1x1x64xf32, #tpu.memory_space<vmem>>, vector<1x1x64xf32>
    %216 = vector.shape_cast %215 : vector<1x1x64xf32> to vector<1x64xf32>
    %217 = vector.broadcast %216 : vector<1x64xf32> to vector<16x64xf32>
    %218 = arith.addf %214, %217 : vector<16x64xf32>
    %219 = arith.truncf %218 : vector<16x64xf32> to vector<16x64xbf16>
    %c0_88 = arith.constant 0 : index
    %c0_89 = arith.constant 0 : index
    %c0_90 = arith.constant 0 : index
    %220 = vector.load %arg11[%c0_88, %c0_89, %c0_90] : memref<1x64x128xbf16, #tpu.memory_space<vmem>>, vector<1x64x128xbf16>
    %221 = vector.shape_cast %220 : vector<1x64x128xbf16> to vector<64x128xbf16>
    %cst_91 = arith.constant dense<0.000000e+00> : vector<16x128xf32>
    %222 = tpu.matmul %219, %221, %cst_91 {dimension_numbers = #tpu.dot_dimension_numbers<[1], [0], [0], [1], [0, 0, 1, 1], [], []>} : vector<16x64xbf16>, vector<64x128xbf16>, vector<16x128xf32> -> vector<16x128xf32>
    %c0_92 = arith.constant 0 : index
    %c0_93 = arith.constant 0 : index
    %c0_94 = arith.constant 0 : index
    %223 = vector.load %arg12[%c0_92, %c0_93, %c0_94] : memref<1x1x128xf32, #tpu.memory_space<vmem>>, vector<1x1x128xf32>
    %224 = vector.shape_cast %223 : vector<1x1x128xf32> to vector<1x128xf32>
    %225 = vector.broadcast %224 : vector<1x128xf32> to vector<16x128xf32>
    %226 = arith.addf %222, %225 : vector<16x128xf32>
    %cst_95 = arith.constant 0.000000e+00 : f32
    %227 = vector.broadcast %cst_95 : f32 to vector<16x128xf32>
    %228 = arith.maximumf %226, %227 : vector<16x128xf32>
    %229 = arith.truncf %228 : vector<16x128xf32> to vector<16x128xbf16>
    %c0_96 = arith.constant 0 : index
    %c0_97 = arith.constant 0 : index
    %c0_98 = arith.constant 0 : index
    %230 = vector.load %arg13[%c0_96, %c0_97, %c0_98] : memref<1x128x64xbf16, #tpu.memory_space<vmem>>, vector<1x128x64xbf16>
    %231 = vector.shape_cast %230 : vector<1x128x64xbf16> to vector<128x64xbf16>
    %cst_99 = arith.constant dense<0.000000e+00> : vector<16x64xf32>
    %232 = tpu.matmul %229, %231, %cst_99 {dimension_numbers = #tpu.dot_dimension_numbers<[1], [0], [0], [1], [0, 0, 1, 1], [], []>} : vector<16x128xbf16>, vector<128x64xbf16>, vector<16x64xf32> -> vector<16x64xf32>
    %c0_100 = arith.constant 0 : index
    %c0_101 = arith.constant 0 : index
    %c0_102 = arith.constant 0 : index
    %233 = vector.load %arg14[%c0_100, %c0_101, %c0_102] : memref<1x1x64xf32, #tpu.memory_space<vmem>>, vector<1x1x64xf32>
    %234 = vector.shape_cast %233 : vector<1x1x64xf32> to vector<1x64xf32>
    %235 = vector.broadcast %234 : vector<1x64xf32> to vector<16x64xf32>
    %236 = arith.addf %232, %235 : vector<16x64xf32>
    %237 = vector.broadcast %6 : vector<16x1xf32> to vector<16x64xf32>
    %238 = arith.mulf %236, %237 : vector<16x64xf32>
    %c1_i32 = arith.constant 1 : i32
    %239 = arith.cmpi slt, %arg1, %c1_i32 : i32
    %240 = arith.extui %239 : i1 to i32
    %c0_i32_103 = arith.constant 0 : i32
    %241 = arith.cmpi ne, %240, %c0_i32_103 : i32
    scf.if %241 {
      %c0_106 = arith.constant 0 : index
      %c0_107 = arith.constant 0 : index
      %c0_108 = arith.constant 0 : index
      %245 = vector.load %arg17[%c0_106, %c0_107, %c0_108] : memref<1x16x64xf32, #tpu.memory_space<vmem>>, vector<1x16x64xf32>
      %246 = vector.shape_cast %245 : vector<1x16x64xf32> to vector<16x64xf32>
      %247 = vector.shape_cast %238 : vector<16x64xf32> to vector<1x16x64xf32>
      tpu.vector_store %arg17[%c0_106, %c0_107, %c0_108], %247 {strides = array<i32>} : memref<1x16x64xf32, #tpu.memory_space<vmem>>, vector<1x16x64xf32>,
    } else {
    }
    %c1_i32_104 = arith.constant 1 : i32
    %242 = arith.cmpi eq, %arg1, %c1_i32_104 : i32
    %243 = arith.extui %242 : i1 to i32
    %c0_i32_105 = arith.constant 0 : i32
    %244 = arith.cmpi ne, %243, %c0_i32_105 : i32
    scf.if %244 {
      %cst_106 = arith.constant dense<0.000000e+00> : vector<16xf32>
      %245 = vector.multi_reduction <add>, %238, %cst_106 [1] : vector<16x64xf32> to vector<16xf32>
      %246 = vector.shape_cast %245 : vector<16xf32> to vector<16x1xf32>
      %cst_107 = arith.constant 6.400000e+01 : f32
      %247 = vector.broadcast %cst_107 : f32 to vector<16x1xf32>
      %248 = arith.divf %246, %247 : vector<16x1xf32>
      %249 = vector.broadcast %248 : vector<16x1xf32> to vector<16x64xf32>
      %250 = arith.subf %238, %249 : vector<16x64xf32>
      %251 = arith.mulf %250, %250 : vector<16x64xf32>
      %cst_108 = arith.constant dense<0.000000e+00> : vector<16xf32>
      %252 = vector.multi_reduction <add>, %251, %cst_108 [1] : vector<16x64xf32> to vector<16xf32>
      %253 = vector.shape_cast %252 : vector<16xf32> to vector<16x1xf32>
      %cst_109 = arith.constant 6.400000e+01 : f32
      %254 = vector.broadcast %cst_109 : f32 to vector<16x1xf32>
      %255 = arith.divf %253, %254 : vector<16x1xf32>
      %256 = vector.broadcast %248 : vector<16x1xf32> to vector<16x64xf32>
      %257 = arith.subf %238, %256 : vector<16x64xf32>
      %cst_110 = arith.constant 9.99999993E-9 : f32
      %258 = vector.broadcast %cst_110 : f32 to vector<16x1xf32>
      %259 = arith.addf %255, %258 : vector<16x1xf32>
      %260 = math.rsqrt %259 : vector<16x1xf32>
      %261 = vector.broadcast %260 : vector<16x1xf32> to vector<16x64xf32>
      %262 = arith.mulf %257, %261 : vector<16x64xf32>
      %c0_111 = arith.constant 0 : index
      %c0_112 = arith.constant 0 : index
      %263 = vector.load %arg15[%c0_111, %c0_112] : memref<1x64xf32, #tpu.memory_space<vmem>>, vector<1x64xf32>
      %264 = vector.broadcast %263 : vector<1x64xf32> to vector<16x64xf32>
      %265 = arith.mulf %262, %264 : vector<16x64xf32>
      %c0_113 = arith.constant 0 : index
      %c0_114 = arith.constant 0 : index
      %266 = vector.load %arg16[%c0_113, %c0_114] : memref<1x64xf32, #tpu.memory_space<vmem>>, vector<1x64xf32>
      %267 = vector.broadcast %266 : vector<1x64xf32> to vector<16x64xf32>
      %268 = arith.addf %265, %267 : vector<16x64xf32>
      %c0_115 = arith.constant 0 : index
      %c0_116 = arith.constant 0 : index
      %c0_117 = arith.constant 0 : index
      %269 = vector.load %arg17[%c0_115, %c0_116, %c0_117] : memref<1x16x64xf32, #tpu.memory_space<vmem>>, vector<1x16x64xf32>
      %270 = vector.shape_cast %269 : vector<1x16x64xf32> to vector<16x64xf32>
      %271 = vector.shape_cast %268 : vector<16x64xf32> to vector<1x16x64xf32>
      tpu.vector_store %arg17[%c0_115, %c0_116, %c0_117], %271 {strides = array<i32>} : memref<1x16x64xf32, #tpu.memory_space<vmem>>, vector<1x16x64xf32>,
    } else {
    }
    return
  }
  func.func @transform_0(%arg0: i32, %arg1: i32) -> (i32, i32, i32) {
    %c0_i32 = arith.constant 0 : i32
    %c0_i32_0 = arith.constant 0 : i32
    %c0_i32_1 = arith.constant 0 : i32
    return %arg0, %c0_i32, %c0_i32_0 : i32, i32, i32
  }
  func.func @transform_1(%arg0: i32, %arg1: i32) -> (i32, i32, i32) {
    %c0_i32 = arith.constant 0 : i32
    %c0_i32_0 = arith.constant 0 : i32
    %c0_i32_1 = arith.constant 0 : i32
    return %arg0, %c0_i32, %c0_i32_0 : i32, i32, i32
  }
  func.func @transform_2(%arg0: i32, %arg1: i32) -> (i32, i32, i32) {
    %c0_i32 = arith.constant 0 : i32
    %c0_i32_0 = arith.constant 0 : i32
    %c0_i32_1 = arith.constant 0 : i32
    return %arg1, %c0_i32, %c0_i32_0 : i32, i32, i32
  }
  func.func @transform_3(%arg0: i32, %arg1: i32) -> (i32, i32, i32) {
    %c0_i32 = arith.constant 0 : i32
    %c0_i32_0 = arith.constant 0 : i32
    %c0_i32_1 = arith.constant 0 : i32
    return %arg1, %c0_i32, %c0_i32_0 : i32, i32, i32
  }
  func.func @transform_4(%arg0: i32, %arg1: i32) -> (i32, i32, i32) {
    %c0_i32 = arith.constant 0 : i32
    %c0_i32_0 = arith.constant 0 : i32
    %c0_i32_1 = arith.constant 0 : i32
    return %arg1, %c0_i32, %c0_i32_0 : i32, i32, i32
  }
  func.func @transform_5(%arg0: i32, %arg1: i32) -> (i32, i32, i32) {
    %c0_i32 = arith.constant 0 : i32
    %c0_i32_0 = arith.constant 0 : i32
    %c0_i32_1 = arith.constant 0 : i32
    return %arg1, %c0_i32, %c0_i32_0 : i32, i32, i32
  }
  func.func @transform_6(%arg0: i32, %arg1: i32) -> (i32, i32, i32) {
    %c0_i32 = arith.constant 0 : i32
    %c0_i32_0 = arith.constant 0 : i32
    %c0_i32_1 = arith.constant 0 : i32
    return %arg1, %c0_i32, %c0_i32_0 : i32, i32, i32
  }
  func.func @transform_7(%arg0: i32, %arg1: i32) -> (i32, i32, i32) {
    %c0_i32 = arith.constant 0 : i32
    %c0_i32_0 = arith.constant 0 : i32
    %c0_i32_1 = arith.constant 0 : i32
    return %arg1, %c0_i32, %c0_i32_0 : i32, i32, i32
  }
  func.func @transform_8(%arg0: i32, %arg1: i32) -> (i32, i32, i32) {
    %c0_i32 = arith.constant 0 : i32
    %c0_i32_0 = arith.constant 0 : i32
    %c0_i32_1 = arith.constant 0 : i32
    return %arg1, %c0_i32, %c0_i32_0 : i32, i32, i32
  }
  func.func @transform_9(%arg0: i32, %arg1: i32) -> (i32, i32, i32) {
    %c0_i32 = arith.constant 0 : i32
    %c0_i32_0 = arith.constant 0 : i32
    %c0_i32_1 = arith.constant 0 : i32
    return %arg1, %c0_i32, %c0_i32_0 : i32, i32, i32
  }
  func.func @transform_10(%arg0: i32, %arg1: i32) -> (i32, i32, i32) {
    %c0_i32 = arith.constant 0 : i32
    %c0_i32_0 = arith.constant 0 : i32
    %c0_i32_1 = arith.constant 0 : i32
    return %arg1, %c0_i32, %c0_i32_0 : i32, i32, i32
  }
  func.func @transform_11(%arg0: i32, %arg1: i32) -> (i32, i32, i32) {
    %c0_i32 = arith.constant 0 : i32
    %c0_i32_0 = arith.constant 0 : i32
    %c0_i32_1 = arith.constant 0 : i32
    return %arg1, %c0_i32, %c0_i32_0 : i32, i32, i32
  }
  func.func @transform_12(%arg0: i32, %arg1: i32) -> (i32, i32, i32) {
    %c0_i32 = arith.constant 0 : i32
    %c0_i32_0 = arith.constant 0 : i32
    %c0_i32_1 = arith.constant 0 : i32
    return %arg1, %c0_i32, %c0_i32_0 : i32, i32, i32
  }
  func.func @transform_13(%arg0: i32, %arg1: i32) -> (i32, i32) {
    %c0_i32 = arith.constant 0 : i32
    %c0_i32_0 = arith.constant 0 : i32
    %c0_i32_1 = arith.constant 0 : i32
    return %c0_i32, %c0_i32_0 : i32, i32
  }
  func.func @transform_14(%arg0: i32, %arg1: i32) -> (i32, i32) {
    %c0_i32 = arith.constant 0 : i32
    %c0_i32_0 = arith.constant 0 : i32
    %c0_i32_1 = arith.constant 0 : i32
    return %c0_i32, %c0_i32_0 : i32, i32
  }
  func.func @transform_15(%arg0: i32, %arg1: i32) -> (i32, i32, i32) {
    %c0_i32 = arith.constant 0 : i32
    %c0_i32_0 = arith.constant 0 : i32
    %c0_i32_1 = arith.constant 0 : i32
    return %arg0, %c0_i32, %c0_i32_0 : i32, i32, i32
  }
}

</mosaic_0001>

<bundles_post_ra>
// kernel: tpu_custom_call.1
= control target key start
LH: loop header
LB: loop body
LE: loop exit
PB: predicated region body
PF: predicated region fallthrough
CT: control target
= control target key end

     0   :  { %s4950_s0 = inlined_call_operand.hbm [shape: f32[2,16,64], index: 0, kind: input, shape index: {}, may-alias: {0,15}]   ;;  %s4951_s1 = inlined_call_operand.vmem [shape: f32[2,16,1], index: 1, kind: input, shape index: {}]   ;;  %s4952_s2 = inlined_call_operand.vmem [shape: bf16[2,64,192], index: 2, kind: input, shape index: {}]   ;;  %s4953_s3 = inlined_call_operand.vmem [shape: bf16[2,64,128], index: 3, kind: input, shape index: {}]   ;;  %s4954_s4 = inlined_call_operand.vmem [shape: f32[2,1,128], index: 4, kind: input, shape index: {}]   ;;  %s4955_s5 = inlined_call_operand.vmem [shape: bf16[2,128,64], index: 5, kind: input, shape index: {}]   ;;  %s4956_s6 = inlined_call_operand.vmem [shape: f32[2,1,64], index: 6, kind: input, shape index: {}]   ;;  %s4957_s7 = inlined_call_operand.vmem [shape: f32[2,1,64], index: 7, kind: input, shape index: {}]   ;;  %s4958_s8 = inlined_call_operand.vmem [shape: f32[2,1,64], index: 8, kind: input, shape index: {}]   ;;  %s4959_s9 = inlined_call_operand.vmem [shape: bf16[2,64,128], index: 9, kind: input, shape index: {}]   ;;  %s4960_s10 = inlined_call_operand.vmem [shape: f32[2,1,128], index: 10, kind: input, shape index: {}]   ;;  %s4961_s11 = inlined_call_operand.vmem [shape: bf16[2,128,64], index: 11, kind: input, shape index: {}]   ;;  %s4962_s12 = inlined_call_operand.vmem [shape: f32[2,1,64], index: 12, kind: input, shape index: {}]   ;;  %s4963_s13 = inlined_call_operand.vmem [shape: f32[1,64], index: 13, kind: input, shape index: {}]   ;;  %s4964_s14 = inlined_call_operand.vmem [shape: f32[1,64], index: 14, kind: input, shape index: {}]   ;;  %s4965_s15 = inlined_call_operand.hbm [shape: f32[2,16,64], index: 15, kind: output, shape index: {}, may-alias: {0,15}]  }
   0x1   :  { %4983 = sst [smem:[#allocation23_spill]] %s4950_s0 }
   0x2   :  { %4984 = sst [smem:[#allocation24_spill]] %s4951_s1 }
   0x3   :  { %4985 = sst [smem:[#allocation25_spill]] %s4952_s2 }
   0x4   :  { %4986 = sst [smem:[#allocation26_spill]] %s4953_s3 }
   0x5   :  { %4987 = sst [smem:[#allocation27_spill]] %s4955_s5 }
   0x6   :  { %4988 = sst [smem:[#allocation28_spill]] %s4957_s7 }
   0x7   :  { %4989 = sst [smem:[#allocation29_spill]] %s4961_s11 }
   0x8   :  { %4990 = sst [smem:[#allocation30_spill]] %s4962_s12 }
   0x9   :  { %4991 = sst [smem:[#allocation31_spill]] %s4963_s13 }
   0xa   :  { %4992 = sst [smem:[#allocation32_spill]] %s4964_s14 }
   0xb   :  { %4993 = sst [smem:[#allocation33_spill]] %s4965_s15 }
   0xc   :  { %20 = vsyncpa [#allocation4], 0 }
   0xd   :  { %22 = vsyncpa [#allocation4 + $0x1], 0 }
   0xe   :  { %23 = vsyncpa [#allocation5], 0 }
   0xf   :  { %25 = vsyncpa [#allocation5 + $0x1], 0  ;;  %s4314_s18 = smov 0   ;;  %s4316_s19 = smov 0  }
  0x10   :  { %s4318_s20 = smov 0   ;;  %s4320_s21 = smov 0  }
  0x11   :  { %s4322_s22 = smov 0   ;;  %s4324_s23 = smov 0  }
  0x12   :  { %s4326_s24 = smov 0   ;;  %s4328_s25 = smov 0  }
  0x13 LB: > { %4994 = sst [smem:[#allocation9_spill]] %s4180_s18  ;;  %s3306_s26 = sadd.s32 4294967295, %s4208_s25   ;;  %s4208_s25 = sphi %s4328_s25, %s31_s25   ;;  %s4204_s24 = sphi %s4326_s24, %s5048_s24   ;;  %s4200_s23 = sphi %s4324_s23, %s5047_s23   ;;  %s4196_s22 = sphi %s4322_s22, %s5046_s22   ;;  %s4192_s21 = sphi %s4320_s21, %s5045_s21   ;;  %s4188_s20 = sphi %s4318_s20, %s5044_s20   ;;  %s4184_s19 = sphi %s4316_s19, %s5043_s19   ;;  %s4180_s18 = sphi %s4314_s18, %s5042_s18  }
  0x14   : > { %4995 = sst [smem:[#allocation10_spill]] %s4184_s19  ;;  %s3307_s27 = sadd.s32 4294967294, %s4208_s25  }
  0x15   : > { %4996 = sst [smem:[#allocation11_spill]] %s4188_s20  ;;  %s40_s28 = sadd.s32 1, %s4200_s23 }
  0x16   : > { %4997 = sst [smem:[#allocation12_spill]] %s4196_s22  ;;  %s43_s29 = sadd.s32 1, %s4204_s24 }
  0x17   : > { %4998 = sst [smem:[#allocation13_spill]] %s4200_s23  ;;  %p41_p0 = scmp.ge.s32.totalorder %s40_s28, 2 }
  0x18   : > { %4999 = sst [smem:[#allocation14_spill]] %s4204_s24  ;;  %s50_s30 = sadd.s32 1, %s4188_s20 }
  0x19   : > { %5000 = sst [smem:[#allocation15_spill]] %s4208_s25  ;;  %p57_p1 = scmp.ne.s32.totalorder %s4188_s20, %s4184_s19 }
  0x1a   : > { %p58_p2 = scmp.eq.s32.totalorder %s4208_s25, 0  ;;  %s5050_s28 = smov (%p41_p0, %s40_s28), 0 }
  0x1b   : > { %5001 = sst [smem:[#allocation16_spill]] %s5050_s28  ;;  %s5052_s29 = smov (!%p41_p0, %s43_s29), %s4204_s24 }
  0x1c   : > { %p4365_p3 = por %p58_p2, %p57_p1  ;;  %p63_p4 = scmp.ne.s32.totalorder %s4184_s19, %s4180_s18 }
  0x1d   : > { %p45_p5 = scmp.ge.s32.totalorder %s5052_s29, 2  ;;  %p64_p6 = scmp.eq.s32.totalorder %s3306_s26, 0 }
  0x1e   : > { %p441_p7 = scmp.eq.s32.totalorder %s3306_s26, 3  ;;  %p447_p8 = scmp.eq.s32.totalorder %s3307_s27, 3 }
  0x1f   : > { %s5054_s29 = smov (%p45_p5, %s5052_s29), 0  ;;  %p4373_p9 = por %p64_p6, %p63_p4 }
  0x20   : > { %5003 = sst [smem:[#allocation17_spill]] %s5054_s29  ;;  %p4377_p10 = por %p441_p7, %p57_p1 }
  0x21   : > { %s47_s23 = ssub.s32 %s4204_s24, %s5054_s29  ;;  %p4383_p11 = por %p447_p8, %p63_p4 }
  0x22   : > { %s5005_s28 = scalar_select %p4377_p10, 1, 0 }
  0x23   : > { %s5007_s18 = scalar_select %p4383_p11, 1, 0 }
  0x24   : > { %5006 = sst [smem:[#allocation18_spill]] %s5005_s28  ;;  %p48_p12 = scmp.eq.s32.totalorder %s47_s23, 0 }
  0x25   : > { %5008 = sst [smem:[#allocation19_spill]] %s5007_s18  ;;  %p3797_p13 = scmp.lt.s32.totalorder %s4208_s25, 4 }
  0x26   : > { %s473_s26 = sand.u32 1, %s4188_s20   ;;  %s3429_s14 = sshll.u32 %s4204_s24, 8 }
  0x27   : > { %s4390_s27 = scalar_select %p48_p12, %s4188_s20, %s50_s30  }
  0x28   : > { %s3310_s15 = sshll.u32 %s473_s26, 4  ;;  %s5010_s0 = sld [smem:[#allocation23_spill]] }
  0x29   : > { %5009 = sst [smem:[#allocation20_spill]] %s4390_s27  ;;  %s477_s29 = scalar_lea.vmem [#allocation3], %s3310_s15 }
  0x2a   : > { %s484_s28 = sshll.u32 %s477_s29, 4  ;;  %p4402_p0 = pnand %p3797_p13, %p4365_p3  ;;  %s4398_s28 = int_to_ptr.vmem [resolvable:$true] %s484_s28 }
  0x2b   : > { %s4407_s30 = scalar_lea.sflag [#allocation4], %s473_s26 }
  0x2c   : > { %p4082_p4 = pneg %p4402_p0 }
  0x2e   : > { %s4396_s11 = scalar_lea.hbm %s5010_s0, %s3429_s14  ;;  %s4085_s15 = scalar_lea.hbm %s5010_s0, 512 }
  0x2f   : > { %s4080_s12 = scalar_lea.hbm %s4396_s11, 256  ;;  %p4086_p3 = scmp.lt.u32.totalorder %s4396_s11, %s5010_s0 }
  0x30   : > { %p4081_p2 = scmp.ne.s32.totalorder %s4396_s11, %s4080_s12  ;;  %p4087_p7 = scmp.lt.u32.totalorder %s4085_s15, %s4080_s12 }
  0x31   : > { %p4089_p12 = scmp.lt.u32.totalorder %s4080_s12, %s4396_s11 }
  0x32   : > { %p4083_p5 = pnand %p4082_p4, %p4081_p2  ;;  %p4088_p8 = por %p4087_p7, %p4086_p3 }
  0x34   : > { %p4084_p6 = pneg %p4083_p5  ;;  %p4090_p13 = por %p4089_p12, %p4088_p8 }
  0x36   : > { %p4091_p1 = pnand %p4090_p13, %p4084_p6 }
  0x38   : > { %4094 = shalt.err (!%p4091_p1)
}
  0x39   : > { %s4095_s26 = scalar_lea.vmem %s4398_s28, 256  ;;  %s4210_s13 = smov [#allocation3]  }
  0x3a   : > { %p4096_p2 = scmp.ne.s32.totalorder %s4398_s28, %s4095_s26  ;;  %s4100_s14 = sshll.u32 %s4210_s13, 4  ;;  %s4101_s14 = int_to_ptr.vmem [resolvable:$false] %s4100_s14 }
  0x3b   : > { %s4102_s29 = scalar_lea.vmem %s4101_s14, 512  ;;  %p4103_p10 = scmp.lt.s32.totalorder %s4398_s28, %s4101_s14 }
  0x3c   : > { %p4098_p5 = pnand %p4096_p2, %p4082_p4  ;;  %p4104_p3 = scmp.lt.s32.totalorder %s4102_s29, %s4095_s26 }
  0x3e   : > { %p4099_p11 = pneg %p4098_p5  ;;  %p4105_p7 = por %p4104_p3, %p4103_p10 }
  0x40   : > { %p4106_p8 = pnand %p4105_p7, %p4099_p11 }
  0x42   : > { %4109 = shalt.err (!%p4106_p8)
}
  0x43   : > { %s4211_s12 = smov 128   ;;  %s4212_s15 = smov 8  }
  0x44   : > { %3792 = dma.hbm_to_vmem [thread:$0]  (!%p4402_p0), %s4396_s11, 256, %s4398_s28, %s4407_s30, %s4211_s12, %s4211_s12, %s4212_s15  }
  0x45   : > { %p576_p1 = scmp.lt.s32.totalorder %s4208_s25, 5  ;;  %p5012_p4 = scmp.ge.s32.totalorder %s4208_s25, 1 }
  0x47   : > { %p577_p6 = pnand %p5012_p4, %p576_p1 }
  0x49   : > { %580 = sbr.rel (%p577_p6) target bundleno = 6175 (0x181f), region = 80 }
  0x50   : > { %s4439_s16 = sand.u32 1, %s4184_s19  }
  0x51   : > { %5013 = sst [smem:[#allocation21_spill]] %s4439_s16  ;;  %s3314_s26 = sshll.u32 %s4439_s16, 4 }
  0x52   : > { %s583_s13 = scalar_lea.sflag [#allocation4], %s4439_s16  ;;  %s586_s14 = scalar_lea.vmem [#allocation3], %s3314_s26 }
  0x53   : > { %4171 = dma.done.wait (%p4373_p9), %s583_s13, 256  }
  0x54   : > { %4173 = vsyncadd (%p4373_p9), %s583_s13, 4294967040  ;;  %p681_p10 = scmp.lt.s32.totalorder %s4196_s22, 1  ;;  %p686_p11 = scmp.lt.s32.totalorder %s4192_s21, 1 }
  0x55   : > { %s5014_s1 = sld [smem:[#allocation24_spill]]  ;;  %s5016_s2 = sld [smem:[#allocation25_spill]] }
  0x56   : > { %s682_s11 = scalar_select %p681_p10, %s4196_s22, 1 }
  0x57   : > { %s4451_s28 = scalar_select %p686_p11, %s4192_s21, 1 }
  0x58   : > { %s3430_s23 = sshll.u32 %s682_s11, 4  ;;  %s5017_s3 = sld [smem:[#allocation26_spill]] }
  0x59   : > { %s3431_s12 = sshll.u32 %s4451_s28, 6  ;;  %s3432_s24 = sshll.u32 %s4451_s28, 5 }
  0x5a   : > { %s5018_s5 = sld [smem:[#allocation27_spill]]  ;;  %s4494_s25 = scalar_lea.vmem %s4959_s9, %s3432_s24 }
  0x5b   : > { %s4456_s29 = scalar_lea.vmem %s5014_s1, %s3430_s23  ;;  %s4462_s0 = scalar_lea.vmem %s5016_s2, %s3431_s12 }
  0x5c   : > { %5015 = sst [smem:[#allocation22_spill]] %s4456_s29  ;;  %s720_s11 = scalar_lea.vmem %s4960_s10, %s4451_s28 }
  0x5d   : > { %s5020_s30 = sld [smem:[#allocation29_spill]]  ;;  %s5021_s22 = sld [smem:[#allocation30_spill]] }
  0x5e   : > { %s4468_s19 = scalar_lea.vmem %s5017_s3, %s3432_s24  ;;  %s712_s3 = scalar_lea.vmem %s4958_s8, %s4451_s28 }
  0x5f   : > { %s4509_s20 = scalar_lea.vmem [#allocation6], %s3314_s26  ;;  %p3328_p9 = scmp.ne.s32.totalorder %s4192_s21, 0 }
  0x60   : > { %s4477_s23 = scalar_lea.vmem %s5018_s5, %s3431_s12  ;;  %v734_v0 = vld [vmem:[%s586_s14] sm:$0xff] (!%p3328_p9)  ;;  %vm736_vm0 = vcmask (!%p3328_p9), 523264   ;;  %v735_v1 = vld [vmem:[%s586_s14 + $0x8] sm:$0xff] (!%p3328_p9) }
  0x61   : > { %733 = sbr.rel (%p3328_p9) target bundleno = 104 (0x68), region = 88  ;;  %737 = vst.msk [vmem:[%s4509_s20] sm:$0xff] (!%p3328_p9), %vm736_vm0, %v734_v0  ;;  %738 = vst.msk [vmem:[%s4509_s20 + $0x8] sm:$0xff] (!%p3328_p9), %vm736_vm0, %v735_v1 }
  0x63   : > { %s4503_s15 = scalar_lea.vmem %s5020_s30, %s3431_s12  ;;  %s728_s7 = scalar_lea.vmem %s5021_s22, %s4451_s28 }
  0x68 PF: > { %v3962_v2 = vld [vmem:[%s4462_s0 + $0x4] ss:$8 sps:$4 sm:$0xff]   ;;  %v3964_v3 = vld [vmem:[%s4462_s0] ss:$8 sps:$4 sm:$0xff]   ;;  %v4213_v4 = vmov 0   ;;  %vm801_vm1 = vcmask 523264   ;;  %v743_v26 = vlaneseq }
  0x69   : > { %837 = vmatprep.mubr.bf16.mxu0 %v4213_v4  ;;  %3960 = vset.pattern.permute.xlu0 %v4213_v4  ;;  %v3965_v5 = vld [vmem:[%s4462_s0 + $0x14] ss:$8 sps:$4 sm:$0xff]   ;;  %v3967_v6 = vld [vmem:[%s4462_s0 + $0x10] ss:$8 sps:$4 sm:$0xff]   ;;  %v3968_v7 = vld [vmem:[%s4462_s0 + $0x24] ss:$8 sps:$4 sm:$0xff]  }
  0x6a   : > { %805 = vmatprep.subr.bf16.mxu0 %v3962_v2  ;;  %3961 = vset.pattern.permute.xlu1 %v4213_v4  ;;  %v3970_v8 = vld [vmem:[%s4462_s0 + $0x20] ss:$8 sps:$4 sm:$0xff]   ;;  %v3971_v9 = vld [vmem:[%s4462_s0 + $0x34] ss:$8 sps:$4 sm:$0xff]   ;;  %v3973_v10 = vld [vmem:[%s4462_s0 + $0x30] ss:$8 sps:$4 sm:$0xff]  }
  0x6b   : > { %806 = vmatpush1.bf16.msra.mxu0 %v3964_v3  ;;  %v739_v11 = vld [vmem:[%s4509_s20] sm:$0xff]  ;;  %v740_v12 = vld [vmem:[%s4509_s20 + $0x8] sm:$0xff]  ;;  %vm854_vm2 = vcmask 64512   ;;  %s4214_s0 = smov 64   ;;  %v744_v27 = vshrl.u32 %v743_v26, 7  ;;  %v747_v29 = vand.u32 127, %v743_v26 }
  0x6c   : > { %807 = vmatprep.subr.bf16.mxu0 %v3965_v5  ;;  %v752_v13 = vpack.c.bf16 %v740_v12, %v739_v11  ;;  %vm4540_vm3 = vmpackc.low %vm854_vm2, %vm854_vm2  ;;  %v4215_v31 = vmov -1e+09   ;;  %vm942_vm6 = vcmask 130048   ;;  %s4216_s5 = smov 56   ;;  %s4217_s22 = smov 120   ;;  %vm1262_vm7 = vcmask 130112  }
  0x6d   : > { %v745_v28 = vadd.s32 8, %v744_v27  ;;  %vm748_vm5 = vcmp.le.s32.totalorder %v747_v29, %v744_v27  ;;  %s4218_s24 = smov 48   ;;  %s4219_s26 = smov 112   ;;  %vm1477_vm8 = vcmask 195712   ;;  %vm1692_vm9 = vcmask 261312  }
  0x6e   : > { %v4552_v35 = vsel %vm748_vm5, 0.0, %v4215_v31  ;;  %s4220_s14 = smov 40   ;;  %s4221_s29 = smov 104   ;;  %vm1907_vm10 = vcmask 326912   ;;  %vm2122_vm11 = vcmask 392512   ;;  %vm2337_vm12 = vcmask 458112  }
  0x6f   : > { %808 = vmatpush1.bf16.msra.mxu0 %v3967_v6  ;;  %vm749_vm4 = vcmp.le.s32.totalorder %v747_v29, %v745_v28  ;;  %s4222_s12 = smov 96   ;;  %s4223_s27 = smov 32   ;;  %vm4231_vm13 = vmmov 0   ;;  %vm2552_vm14 = vcmask 523712  }
  0x70   : > { %809 = vmatprep.subr.bf16.mxu0 %v3968_v7  ;;  %v4550_v32 = vsel %vm749_vm4, 0.0, %v4215_v31  ;;  %s4224_s18 = smov 88   ;;  %s4225_s16 = smov 24  }
  0x71   : > { %s4226_s17 = smov 80   ;;  %s4227_s1 = smov 16  }
  0x72   : > { %s4228_s30 = smov 72   ;;  %s4229_s2 = smov 8  }
  0x73   : > { %810 = vmatpush1.bf16.msra.mxu0 %v3970_v8  ;;  %p3420_p0 = scmp.ge.s32.totalorder %s4192_s21, 1 }
  0x74   : > { %811 = vmatprep.subr.bf16.mxu0 %v3971_v9 }
  0x77   : > { %812 = vmatpush1.bf16.msra.mxu0 %v3973_v10 }
  0x7a   : > { %3337 = vmatmul.mubr.msk.bf16.vlgmr.msra.gmra.mrb[0].mxu0 %vm801_vm1, %v752_v13 }
 0x14d   : > { %v4525_v14 = vpop.f32.mrb[0].mxu0 }
 0x14e   : > { %v841_v15 = vpop.f32.mrb[1].mxu0  ;;  %3533 = vmatprep.mubr.msk.f32.mxu1 %vm854_vm2, %v4525_v14 }
 0x14f   : > { %v4529_v16 = vpop.f32.mrb[2].mxu0 }
 0x150   : > { %v845_v17 = vpop.f32.mrb[3].mxu0  ;;  %v4533_v18 = vpack.i.bf16 %v4529_v16, %v4525_v14 }
 0x151   : > { %v3711_v19 = vpack.c.bf16 %v845_v17, %v841_v15  ;;  %v4535_v20 = vpack.i.bf16 %v845_v17, %v841_v15 }
 0x152   : > { %3886 = vrot.lane.b32.xlu0 %v4533_v18, %s4214_s0  ;;  %s5024_s0 = scalar_lea.vmem %s4954_s4, %s4451_s28 }
 0x1c4   : > { %v3887_v21 = vpop.permute.xlu0 %3886 }
 0x1c5   : > { %v3889_v22 = vunpack.i.h.bf16 %v3887_v21  ;;  %v3888_v23 = vunpack.i.l.bf16 %v3887_v21 }
 0x1c7   : > { %v3705_v25 = vpack.c.bf16 %v3889_v22, %v3888_v23 }
 0x1c9   : > { %3707 = vmatprep.subr.msk.bf16.mxu1 %vm4540_vm3, %v3705_v25 }
 0x1ca   : > { %3710 = vmatpush3.bf16.xpose.msk.msra.mxu1 %vm4540_vm3, %v3705_v25 }
 0x1cb   : > { %3712 = vmatprep.subr.bf16.mxu1 %v3711_v19 }
 0x1d1   : > { %3534 = vmatmul.mubr.msk.f32.vlgmr.msra.gmra.mrb[0].mxu1 %vm854_vm2, %v4529_v16 }
 0x1d2   : > { %3714 = vmatpush3.bf16.msra.mxu1 %v3711_v19 }
 0x2a4   : > { %v3535_v30 = vpop.f32.mrb[0].mxu1 }
 0x2a5   : > { %v939_v33 = vmul.f32 0.35355338, %v3535_v30  ;;  %v929_v34 = vpop.f32.mrb[1].mxu1 }
 0x2a6   : > { %v938_v36 = vmul.f32 0.35355338, %v929_v34 }
 0x2a7   : > { %v941_v37 = vadd.f32 %v939_v33, %v4550_v32 }
 0x2a8   : > { %v940_v38 = vadd.f32 %v938_v36, %v4552_v35 }
 0x2a9   : > { %v946_v39 = vsel %vm942_vm6, %v941_v37, -inf }
 0x2aa   : > { %947 = vmax.xlane.f32.xlu1 %v946_v39  ;;  %v943_v40 = vsel %vm942_vm6, %v940_v38, -inf }
 0x2ab   : > { %944 = vmax.xlane.f32.xlu0 %v943_v40 }
 0x2bb   : > { %3891 = vrot.lane.b32.xlu1 %v4533_v18, %s4216_s5 }
 0x2bf   : > { %1048 = vrot.lane.b32.xlu1 %v4525_v14, %s4217_s22 }
 0x2c1   : > { %1050 = vrot.lane.b32.xlu0 %v4529_v16, %s4217_s22 }
 0x337   : > { %v948_v41 = vpop.xlane.xlu1 %947 }
 0x338   : > { %v950_v42 = vsub.f32 %v941_v37, %v948_v41  ;;  %v945_v43 = vpop.xlane.xlu0 %944 }
 0x339   : > { %v949_v44 = vsub.f32 %v940_v38, %v945_v43 }
 0x33a   : > { %v953_v45 = vmul.f32 1.442695, %v950_v42 }
 0x33b   : > { %v951_v46 = vmul.f32 1.442695, %v949_v44  ;;  %v3892_v47 = vpop.permute.xlu1 %3891 }
 0x33c   : > { %3998 = vpow2.f32 %v953_v45  ;;  %v3894_v48 = vunpack.i.h.bf16 %v3892_v47  ;;  %v3893_v49 = vunpack.i.l.bf16 %v3892_v47  ;;  %v1051_v2 = vpop.permute.xlu0 %1050 }
 0x33d   : > { %4000 = vpow2.f32 %v951_v46 }
 0x33e   : > { %v3715_v50 = vpack.c.bf16 %v3894_v48, %v3893_v49 }
 0x33f   : > { %v1049_v55 = vpop.permute.xlu1 %1048 }
 0x340   : > { %3717 = vmatprep.subr.msk.bf16.mxu1 %vm4540_vm3, %v3715_v50 }
 0x346   : > { %v3999_v51 = vpop.eup %3998 }
 0x347   : > { %v958_v52 = vsel %vm942_vm6, %v3999_v51, 0.0  ;;  %v4001_v53 = vpop.eup %4000 }
 0x348   : > { %959 = vadd.xlane.f32.xlu1 %v958_v52  ;;  %v955_v54 = vsel %vm942_vm6, %v4001_v53, 0.0 }
 0x34c   : > { %956 = vadd.xlane.f32.xlu1 %v955_v54 }
 0x35d   : > { %3896 = vrot.lane.b32.xlu1 %v4533_v18, %s4218_s24 }
 0x361   : > { %1265 = vrot.lane.b32.xlu1 %v4525_v14, %s4219_s26 }
 0x365   : > { %1267 = vrot.lane.b32.xlu1 %v4529_v16, %s4219_s26 }
 0x3d5   : > { %v960_v56 = vpop.xlane.xlu1 %959 }
 0x3d6   : > { %4002 = vrcp.f32 %v960_v56 }
 0x3d9   : > { %v957_v57 = vpop.xlane.xlu1 %956 }
 0x3da   : > { %4004 = vrcp.f32 %v957_v57 }
 0x3dd   : > { %v3897_v58 = vpop.permute.xlu1 %3896 }
 0x3de   : > { %v3899_v61 = vunpack.i.h.bf16 %v3897_v58  ;;  %v3898_v62 = vunpack.i.l.bf16 %v3897_v58 }
 0x3e0   : > { %v4003_v59 = vpop.eup %4002  ;;  %v3725_v1 = vpack.c.bf16 %v3899_v61, %v3898_v62 }
 0x3e1   : > { %v964_v0 = vmul.f32 %v4003_v59, %v3999_v51  ;;  %v1266_v3 = vpop.permute.xlu1 %1265 }
 0x3e4   : > { %v4005_v60 = vpop.eup %4004 }
 0x3e5   : > { %v963_v63 = vmul.f32 %v4005_v60, %v4001_v53  ;;  %v1268_v4 = vpop.permute.xlu1 %1267 }
 0x3e7   : > { %3540 = vmatprep.mubr.msk.f32.mxu1 %vm942_vm6, %v963_v63 }
 0x3e8   : > { %3541 = vmatmul.mubr.msk.f32.vlgmr.msra.gmra.mrb[2].mxu1 %vm942_vm6, %v964_v0 }
 0x3e9   : > { %3720 = vmatpush3.bf16.xpose.msk.msra.mxu1 %vm4540_vm3, %v3715_v50  ;;  %3547 = vmatprep.mubr.msk.f32.mxu1 %vm854_vm2, %v1049_v55 }
 0x3ea   : > { %3727 = vmatprep.subr.msk.bf16.mxu1 %vm4540_vm3, %v3725_v1 }
 0x3f0   : > { %3548 = vmatmul.mubr.msk.f32.vlgmr.msra.gmra.mrb[4].mxu1 %vm854_vm2, %v1051_v2 }
 0x3f1   : > { %3730 = vmatpush3.bf16.xpose.msk.msra.mxu1 %vm4540_vm3, %v3725_v1  ;;  %3561 = vmatprep.mubr.msk.f32.mxu1 %vm854_vm2, %v1266_v3 }
 0x3f8   : > { %3562 = vmatmul.mubr.msk.f32.vlgmr.msra.gmra.mrb[6].mxu1 %vm854_vm2, %v1268_v4 }
 0x4bb   : > { %v3542_v5 = vpop.f32.mrb[2].mxu1 }
 0x4bc   : > { %1047 = vst.msk [vmem:[#allocation2 + $0x8] sm:$0xff] %vm854_vm2, %v3542_v5  ;;  %v1037_v6 = vpop.f32.mrb[3].mxu1 }
 0x4bd   : > { %1046 = vst.msk [vmem:[#allocation2] sm:$0xff] %vm854_vm2, %v1037_v6 }
 0x4c3   : > { %v3549_v7 = vpop.f32.mrb[4].mxu1 }
 0x4c4   : > { %v1140_v8 = vmul.f32 0.35355338, %v3549_v7  ;;  %v1130_v9 = vpop.f32.mrb[5].mxu1 }
 0x4c5   : > { %v1139_v10 = vmul.f32 0.35355338, %v1130_v9 }
 0x4c6   : > { %v1142_v11 = vadd.f32 %v1140_v8, %v4550_v32 }
 0x4c7   : > { %v1141_v12 = vadd.f32 %v1139_v10, %v4552_v35 }
 0x4c8   : > { %v1146_v13 = vsel %vm942_vm6, %v1142_v11, -inf }
 0x4c9   : > { %1147 = vmax.xlane.f32.xlu0 %v1146_v13  ;;  %v1143_v15 = vsel %vm942_vm6, %v1141_v12, -inf }
 0x4ca   : > { %1144 = vmax.xlane.f32.xlu1 %v1143_v15 }
 0x4cb   : > { %v3563_v17 = vpop.f32.mrb[6].mxu1 }
 0x4cc   : > { %v1347_v19 = vpop.f32.mrb[7].mxu1  ;;  %v1357_v21 = vmul.f32 0.35355338, %v3563_v17 }
 0x4cd   : > { %v1356_v22 = vmul.f32 0.35355338, %v1347_v19 }
 0x4ce   : > { %v1359_v26 = vadd.f32 %v1357_v21, %v4550_v32 }
 0x4cf   : > { %v1358_v23 = vadd.f32 %v1356_v22, %v4552_v35 }
 0x4d0   : > { %v1363_v27 = vsel %vm942_vm6, %v1359_v26, -inf }
 0x4d1   : > { %v1360_v25 = vsel %vm942_vm6, %v1358_v23, -inf }
 0x4d2   : > { %1361 = vmax.xlane.f32.xlu1 %v1360_v25 }
 0x4d6   : > { %1364 = vmax.xlane.f32.xlu1 %v1363_v27 }
 0x556   : > { %v1148_v28 = vpop.xlane.xlu0 %1147 }
 0x557   : > { %v1150_v29 = vsub.f32 %v1142_v11, %v1148_v28  ;;  %v1145_v30 = vpop.xlane.xlu1 %1144 }
 0x558   : > { %v1149_v31 = vsub.f32 %v1141_v12, %v1145_v30 }
 0x559   : > { %v1153_v33 = vmul.f32 1.442695, %v1150_v29 }
 0x55a   : > { %v1151_v34 = vmul.f32 1.442695, %v1149_v31 }
 0x55b   : > { %4006 = vpow2.f32 %v1153_v33 }
 0x55c   : > { %4008 = vpow2.f32 %v1151_v34 }
 0x55f   : > { %v1362_v36 = vpop.xlane.xlu1 %1361 }
 0x560   : > { %v1366_v37 = vsub.f32 %v1358_v23, %v1362_v36 }
 0x562   : > { %v1368_v38 = vmul.f32 1.442695, %v1366_v37 }
 0x563   : > { %v1365_v39 = vpop.xlane.xlu1 %1364 }
 0x564   : > { %4010 = vpow2.f32 %v1368_v38  ;;  %v1367_v40 = vsub.f32 %v1359_v26, %v1365_v39 }
 0x565   : > { %v4007_v41 = vpop.eup %4006 }
 0x566   : > { %v4009_v42 = vpop.eup %4008  ;;  %v1370_v43 = vmul.f32 1.442695, %v1367_v40  ;;  %v1158_v44 = vsel %vm942_vm6, %v4007_v41, 0.0 }
 0x567   : > { %1159 = vadd.xlane.f32.xlu1 %v1158_v44  ;;  %v1155_v45 = vsel %vm942_vm6, %v4009_v42, 0.0 }
 0x568   : > { %4012 = vpow2.f32 %v1370_v43  ;;  %1156 = vadd.xlane.f32.xlu0 %v1155_v45 }
 0x56e   : > { %v4011_v46 = vpop.eup %4010 }
 0x56f   : > { %v1372_v47 = vsel %vm942_vm6, %v4011_v46, 0.0 }
 0x570   : > { %1373 = vadd.xlane.f32.xlu0 %v1372_v47 }
 0x572   : > { %v4013_v48 = vpop.eup %4012 }
 0x573   : > { %v1375_v49 = vsel %vm942_vm6, %v4013_v48, 0.0 }
 0x574   : > { %1376 = vadd.xlane.f32.xlu1 %v1375_v49 }
 0x585   : > { %3906 = vrot.lane.b32.xlu1 %v4535_v20, %s4219_s26 }
 0x586   : > { %3901 = vrot.lane.b32.xlu0 %v4535_v20, %s4217_s22  ;;  %s5025_s22 = scalar_lea.vmem %s4956_s6, %s4451_s28 }
 0x589   : > { %3911 = vrot.lane.b32.xlu1 %v4533_v18, %s4220_s14 }
 0x58a   : > { %1480 = vrot.lane.b32.xlu0 %v4525_v14, %s4221_s29 }
 0x58d   : > { %1482 = vrot.lane.b32.xlu1 %v4529_v16, %s4221_s29 }
 0x5f4   : > { %v1160_v51 = vpop.xlane.xlu1 %1159 }
 0x5f5   : > { %v1157_v50 = vpop.xlane.xlu0 %1156 }
 0x5f6   : > { %4014 = vrcp.f32 %v1157_v50 }
 0x5f7   : > { %4016 = vrcp.f32 %v1160_v51 }
 0x5fd   : > { %v1374_v52 = vpop.xlane.xlu0 %1373 }
 0x5fe   : > { %4018 = vrcp.f32 %v1374_v52 }
 0x600   : > { %v4015_v53 = vpop.eup %4014 }
 0x601   : > { %v3902_v54 = vpop.permute.xlu0 %3901  ;;  %v1377_v55 = vpop.xlane.xlu1 %1376  ;;  %v1163_v56 = vmul.f32 %v4015_v53, %v4009_v42 }
 0x602   : > { %v3904_v57 = vunpack.i.h.bf16 %v3902_v54  ;;  %v3903_v58 = vunpack.i.l.bf16 %v3902_v54  ;;  %4020 = vrcp.f32 %v1377_v55  ;;  %v4017_v60 = vpop.eup %4016 }
 0x603   : > { %3554 = vmatprep.mubr.msk.f32.mxu0 %vm942_vm6, %v1163_v56  ;;  %v1164_v1 = vmul.f32 %v4017_v60, %v4007_v41 }
 0x604   : > { %v3721_v59 = vpack.c.bf16 %v3904_v57, %v3903_v58 }
 0x605   : > { %v3907_v61 = vpop.permute.xlu1 %3906  ;;  %v1481_v10 = vpop.permute.xlu0 %1480 }
 0x606   : > { %v3909_v62 = vunpack.i.h.bf16 %v3907_v61  ;;  %v3908_v63 = vunpack.i.l.bf16 %v3907_v61  ;;  %3722 = vmatprep.subr.bf16.mxu0 %v3721_v59 }
 0x607   : > { %3724 = vmatpush3.bf16.msra.mxu0 %v3721_v59 }
 0x608   : > { %v4019_v0 = vpop.eup %4018  ;;  %v3731_v2 = vpack.c.bf16 %v3909_v62, %v3908_v63 }
 0x609   : > { %v3912_v3 = vpop.permute.xlu1 %3911  ;;  %v1380_v4 = vmul.f32 %v4019_v0, %v4011_v46 }
 0x60a   : > { %v3914_v5 = vunpack.i.h.bf16 %v3912_v3  ;;  %v3913_v6 = vunpack.i.l.bf16 %v3912_v3  ;;  %3555 = vmatmul.mubr.msk.f32.vlgmr.msra.gmra.mrb[4].mxu0 %vm942_vm6, %v1164_v1  ;;  %3732 = vmatprep.subr.bf16.mxu0 %v3731_v2 }
 0x60b   : > { %3734 = vmatpush3.bf16.msra.mxu0 %v3731_v2  ;;  %3568 = vmatprep.mubr.msk.f32.mxu0 %vm942_vm6, %v1380_v4 }
 0x60c   : > { %v4021_v7 = vpop.eup %4020  ;;  %v3735_v8 = vpack.c.bf16 %v3914_v5, %v3913_v6 }
 0x60d   : > { %v1381_v9 = vmul.f32 %v4021_v7, %v4013_v48  ;;  %v1483_v11 = vpop.permute.xlu1 %1482 }
 0x60e   : > { %3737 = vmatprep.subr.msk.bf16.mxu0 %vm4540_vm3, %v3735_v8 }
 0x60f   : > { %3569 = vmatmul.mubr.msk.f32.vlgmr.msra.gmra.mrb[6].mxu0 %vm942_vm6, %v1381_v9 }
 0x610   : > { %3575 = vmatprep.mubr.msk.f32.mxu0 %vm854_vm2, %v1481_v10 }
 0x614   : > { %3740 = vmatpush3.bf16.xpose.msk.msra.mxu0 %vm4540_vm3, %v3735_v8 }
 0x61b   : > { %3576 = vmatmul.mubr.msk.f32.vlgmr.msra.gmra.mrb[8].mxu0 %vm854_vm2, %v1483_v11 }
 0x6dd   : > { %v4620_v12 = vpop.f32.mrb[4].mxu0 }
 0x6de   : > { %v4622_v13 = vpop.f32.mrb[5].mxu0 }
 0x6e2   : > { %v4624_v15 = vpop.f32.mrb[6].mxu0 }
 0x6e3   : > { %v4626_v17 = vpop.f32.mrb[7].mxu0 }
 0x6ee   : > { %v3577_v19 = vpop.f32.mrb[8].mxu0 }
 0x6ef   : > { %v1572_v21 = vmul.f32 0.35355338, %v3577_v19  ;;  %v1562_v22 = vpop.f32.mrb[9].mxu0 }
 0x6f0   : > { %v1571_v23 = vmul.f32 0.35355338, %v1562_v22 }
 0x6f1   : > { %v1574_v25 = vadd.f32 %v1572_v21, %v4550_v32 }
 0x6f2   : > { %v1573_v26 = vadd.f32 %v1571_v23, %v4552_v35 }
 0x6f3   : > { %v1578_v27 = vsel %vm942_vm6, %v1574_v25, -inf }
 0x6f4   : > { %1579 = vmax.xlane.f32.xlu1 %v1578_v27  ;;  %v1575_v28 = vsel %vm942_vm6, %v1573_v26, -inf }
 0x6f5   : > { %1576 = vmax.xlane.f32.xlu0 %v1575_v28 }
 0x705   : > { %3916 = vrot.lane.b32.xlu1 %v4535_v20, %s4221_s29 }
 0x709   : > { %1695 = vrot.lane.b32.xlu1 %v4525_v14, %s4222_s12 }
 0x70d   : > { %1697 = vrot.lane.b32.xlu1 %v4529_v16, %s4222_s12 }
 0x781   : > { %v1580_v29 = vpop.xlane.xlu1 %1579 }
 0x782   : > { %v1582_v30 = vsub.f32 %v1574_v25, %v1580_v29  ;;  %v1577_v31 = vpop.xlane.xlu0 %1576 }
 0x783   : > { %v1581_v33 = vsub.f32 %v1573_v26, %v1577_v31 }
 0x784   : > { %v1585_v34 = vmul.f32 1.442695, %v1582_v30 }
 0x785   : > { %v1583_v36 = vmul.f32 1.442695, %v1581_v33  ;;  %v3917_v37 = vpop.permute.xlu1 %3916 }
 0x786   : > { %4022 = vpow2.f32 %v1585_v34  ;;  %v3919_v38 = vunpack.i.h.bf16 %v3917_v37  ;;  %v3918_v39 = vunpack.i.l.bf16 %v3917_v37 }
 0x787   : > { %4024 = vpow2.f32 %v1583_v36 }
 0x788   : > { %v3741_v40 = vpack.c.bf16 %v3919_v38, %v3918_v39 }
 0x789   : > { %v1696_v55 = vpop.permute.xlu1 %1695 }
 0x78a   : > { %3742 = vmatprep.subr.bf16.mxu1 %v3741_v40 }
 0x78b   : > { %3744 = vmatpush3.bf16.msra.mxu1 %v3741_v40 }
 0x78d   : > { %v1698_v56 = vpop.permute.xlu1 %1697 }
 0x790   : > { %v4023_v41 = vpop.eup %4022 }
 0x791   : > { %v1590_v42 = vsel %vm942_vm6, %v4023_v41, 0.0  ;;  %v4025_v43 = vpop.eup %4024 }
 0x792   : > { %1591 = vadd.xlane.f32.xlu0 %v1590_v42  ;;  %v1587_v44 = vsel %vm942_vm6, %v4025_v43, 0.0 }
 0x796   : > { %1588 = vadd.xlane.f32.xlu0 %v1587_v44 }
 0x7ac   : > { %3921 = vrot.lane.b32.xlu0 %v4533_v18, %s4223_s27 }
 0x81f   : > { %v1592_v45 = vpop.xlane.xlu0 %1591 }
 0x820   : > { %4026 = vrcp.f32 %v1592_v45 }
 0x823   : > { %v1589_v46 = vpop.xlane.xlu0 %1588 }
 0x824   : > { %4028 = vrcp.f32 %v1589_v46 }
 0x827   : > { %v3922_v47 = vpop.permute.xlu0 %3921 }
 0x828   : > { %v3924_v48 = vunpack.i.h.bf16 %v3922_v47  ;;  %v3923_v49 = vunpack.i.l.bf16 %v3922_v47 }
 0x82a   : > { %v3745_v50 = vpack.c.bf16 %v3924_v48, %v3923_v49  ;;  %v4027_v51 = vpop.eup %4026 }
 0x82b   : > { %v1596_v54 = vmul.f32 %v4027_v51, %v4023_v41 }
 0x82c   : > { %3747 = vmatprep.subr.msk.bf16.mxu1 %vm4540_vm3, %v3745_v50 }
 0x82e   : > { %v4029_v52 = vpop.eup %4028 }
 0x82f   : > { %v1595_v53 = vmul.f32 %v4029_v52, %v4025_v43 }
 0x831   : > { %3582 = vmatprep.mubr.msk.f32.mxu1 %vm942_vm6, %v1595_v53 }
 0x832   : > { %3583 = vmatmul.mubr.msk.f32.vlgmr.msra.gmra.mrb[8].mxu1 %vm942_vm6, %v1596_v54 }
 0x833   : > { %3750 = vmatpush3.bf16.xpose.msk.msra.mxu1 %vm4540_vm3, %v3745_v50  ;;  %3589 = vmatprep.mubr.msk.f32.mxu1 %vm854_vm2, %v1696_v55 }
 0x83a   : > { %3590 = vmatmul.mubr.msk.f32.vlgmr.msra.gmra.mrb[10].mxu1 %vm854_vm2, %v1698_v56 }
 0x905   : > { %v4650_v57 = vpop.f32.mrb[8].mxu1 }
 0x906   : > { %v4652_v58 = vpop.f32.mrb[9].mxu1 }
 0x90d   : > { %v3591_v59 = vpop.f32.mrb[10].mxu1 }
 0x90e   : > { %v1787_v60 = vmul.f32 0.35355338, %v3591_v59  ;;  %v1777_v61 = vpop.f32.mrb[11].mxu1 }
 0x90f   : > { %v1786_v62 = vmul.f32 0.35355338, %v1777_v61 }
 0x910   : > { %v1789_v63 = vadd.f32 %v1787_v60, %v4550_v32 }
 0x911   : > { %v1788_v0 = vadd.f32 %v1786_v62, %v4552_v35 }
 0x912   : > { %v1793_v1 = vsel %vm942_vm6, %v1789_v63, -inf }
 0x913   : > { %1794 = vmax.xlane.f32.xlu1 %v1793_v1  ;;  %v1790_v2 = vsel %vm942_vm6, %v1788_v0, -inf }
 0x914   : > { %1791 = vmax.xlane.f32.xlu0 %v1790_v2 }
 0x924   : > { %3926 = vrot.lane.b32.xlu1 %v4535_v20, %s4222_s12 }
 0x928   : > { %1910 = vrot.lane.b32.xlu1 %v4525_v14, %s4224_s18 }
 0x92c   : > { %1912 = vrot.lane.b32.xlu1 %v4529_v16, %s4224_s18 }
 0x9a0   : > { %v1795_v3 = vpop.xlane.xlu1 %1794 }
 0x9a1   : > { %v1797_v4 = vsub.f32 %v1789_v63, %v1795_v3  ;;  %v1792_v5 = vpop.xlane.xlu0 %1791 }
 0x9a2   : > { %v1796_v6 = vsub.f32 %v1788_v0, %v1792_v5 }
 0x9a3   : > { %v1800_v7 = vmul.f32 1.442695, %v1797_v4 }
 0x9a4   : > { %v1798_v8 = vmul.f32 1.442695, %v1796_v6  ;;  %v3927_v9 = vpop.permute.xlu1 %3926 }
 0x9a5   : > { %4030 = vpow2.f32 %v1800_v7  ;;  %v3929_v10 = vunpack.i.h.bf16 %v3927_v9  ;;  %v3928_v11 = vunpack.i.l.bf16 %v3927_v9 }
 0x9a6   : > { %4032 = vpow2.f32 %v1798_v8 }
 0x9a7   : > { %v3751_v19 = vpack.c.bf16 %v3929_v10, %v3928_v11 }
 0x9a8   : > { %v1911_v38 = vpop.permute.xlu1 %1910 }
 0x9a9   : > { %3752 = vmatprep.subr.bf16.mxu0 %v3751_v19 }
 0x9aa   : > { %3754 = vmatpush3.bf16.msra.mxu0 %v3751_v19 }
 0x9ac   : > { %v1913_v39 = vpop.permute.xlu1 %1912 }
 0x9af   : > { %v4031_v21 = vpop.eup %4030 }
 0x9b0   : > { %v1805_v22 = vsel %vm942_vm6, %v4031_v21, 0.0  ;;  %v4033_v23 = vpop.eup %4032 }
 0x9b1   : > { %1806 = vadd.xlane.f32.xlu0 %v1805_v22  ;;  %v1802_v25 = vsel %vm942_vm6, %v4033_v23, 0.0 }
 0x9b5   : > { %1803 = vadd.xlane.f32.xlu0 %v1802_v25 }
 0x9cb   : > { %3931 = vrot.lane.b32.xlu0 %v4533_v18, %s4225_s16 }
 0xa3e   : > { %v1807_v26 = vpop.xlane.xlu0 %1806 }
 0xa3f   : > { %4034 = vrcp.f32 %v1807_v26 }
 0xa42   : > { %v1804_v27 = vpop.xlane.xlu0 %1803 }
 0xa43   : > { %4036 = vrcp.f32 %v1804_v27 }
 0xa46   : > { %v3932_v28 = vpop.permute.xlu0 %3931 }
 0xa47   : > { %v3934_v29 = vunpack.i.h.bf16 %v3932_v28  ;;  %v3933_v30 = vunpack.i.l.bf16 %v3932_v28 }
 0xa49   : > { %v3755_v31 = vpack.c.bf16 %v3934_v29, %v3933_v30  ;;  %v4035_v33 = vpop.eup %4034 }
 0xa4a   : > { %v1811_v37 = vmul.f32 %v4035_v33, %v4031_v21 }
 0xa4b   : > { %3757 = vmatprep.subr.msk.bf16.mxu0 %vm4540_vm3, %v3755_v31 }
 0xa4d   : > { %v4037_v34 = vpop.eup %4036 }
 0xa4e   : > { %v1810_v36 = vmul.f32 %v4037_v34, %v4033_v23 }
 0xa50   : > { %3596 = vmatprep.mubr.msk.f32.mxu0 %vm942_vm6, %v1810_v36 }
 0xa51   : > { %3597 = vmatmul.mubr.msk.f32.vlgmr.msra.gmra.mrb[10].mxu0 %vm942_vm6, %v1811_v37 }
 0xa52   : > { %3760 = vmatpush3.bf16.xpose.msk.msra.mxu0 %vm4540_vm3, %v3755_v31  ;;  %3603 = vmatprep.mubr.msk.f32.mxu0 %vm854_vm2, %v1911_v38 }
 0xa59   : > { %3604 = vmatmul.mubr.msk.f32.vlgmr.msra.gmra.mrb[12].mxu0 %vm854_vm2, %v1913_v39 }
 0xb24   : > { %v4676_v40 = vpop.f32.mrb[10].mxu0 }
 0xb25   : > { %v4678_v41 = vpop.f32.mrb[11].mxu0 }
 0xb2c   : > { %v3605_v42 = vpop.f32.mrb[12].mxu0 }
 0xb2d   : > { %v2002_v43 = vmul.f32 0.35355338, %v3605_v42  ;;  %v1992_v44 = vpop.f32.mrb[13].mxu0 }
 0xb2e   : > { %v2001_v45 = vmul.f32 0.35355338, %v1992_v44 }
 0xb2f   : > { %v2004_v46 = vadd.f32 %v2002_v43, %v4550_v32 }
 0xb30   : > { %v2003_v47 = vadd.f32 %v2001_v45, %v4552_v35 }
 0xb31   : > { %v2008_v48 = vsel %vm942_vm6, %v2004_v46, -inf }
 0xb32   : > { %2009 = vmax.xlane.f32.xlu1 %v2008_v48  ;;  %v2005_v49 = vsel %vm942_vm6, %v2003_v47, -inf }
 0xb33   : > { %2006 = vmax.xlane.f32.xlu0 %v2005_v49 }
 0xb43   : > { %3936 = vrot.lane.b32.xlu1 %v4535_v20, %s4224_s18 }
 0xb47   : > { %2125 = vrot.lane.b32.xlu1 %v4525_v14, %s4226_s17 }
 0xb4b   : > { %2127 = vrot.lane.b32.xlu1 %v4529_v16, %s4226_s17 }
 0xbbf   : > { %v2010_v50 = vpop.xlane.xlu1 %2009 }
 0xbc0   : > { %v2012_v51 = vsub.f32 %v2004_v46, %v2010_v50  ;;  %v2007_v52 = vpop.xlane.xlu0 %2006 }
 0xbc1   : > { %v2011_v53 = vsub.f32 %v2003_v47, %v2007_v52 }
 0xbc2   : > { %v2015_v54 = vmul.f32 1.442695, %v2012_v51 }
 0xbc3   : > { %v2013_v55 = vmul.f32 1.442695, %v2011_v53  ;;  %v3937_v56 = vpop.permute.xlu1 %3936 }
 0xbc4   : > { %4038 = vpow2.f32 %v2015_v54  ;;  %v3939_v59 = vunpack.i.h.bf16 %v3937_v56  ;;  %v3938_v60 = vunpack.i.l.bf16 %v3937_v56 }
 0xbc5   : > { %4040 = vpow2.f32 %v2013_v55 }
 0xbc6   : > { %v3761_v61 = vpack.c.bf16 %v3939_v59, %v3938_v60 }
 0xbc7   : > { %v2126_v19 = vpop.permute.xlu1 %2125 }
 0xbc8   : > { %3762 = vmatprep.subr.bf16.mxu1 %v3761_v61 }
 0xbc9   : > { %3764 = vmatpush3.bf16.msra.mxu1 %v3761_v61 }
 0xbcb   : > { %v2128_v21 = vpop.permute.xlu1 %2127 }
 0xbce   : > { %v4039_v62 = vpop.eup %4038 }
 0xbcf   : > { %v2020_v63 = vsel %vm942_vm6, %v4039_v62, 0.0  ;;  %v4041_v0 = vpop.eup %4040 }
 0xbd0   : > { %2021 = vadd.xlane.f32.xlu0 %v2020_v63  ;;  %v2017_v1 = vsel %vm942_vm6, %v4041_v0, 0.0 }
 0xbd4   : > { %2018 = vadd.xlane.f32.xlu0 %v2017_v1 }
 0xbea   : > { %3941 = vrot.lane.b32.xlu0 %v4533_v18, %s4227_s1 }
 0xc5d   : > { %v2022_v2 = vpop.xlane.xlu0 %2021 }
 0xc5e   : > { %4042 = vrcp.f32 %v2022_v2 }
 0xc61   : > { %v2019_v3 = vpop.xlane.xlu0 %2018 }
 0xc62   : > { %4044 = vrcp.f32 %v2019_v3 }
 0xc65   : > { %v3942_v4 = vpop.permute.xlu0 %3941 }
 0xc66   : > { %v3944_v5 = vunpack.i.h.bf16 %v3942_v4  ;;  %v3943_v6 = vunpack.i.l.bf16 %v3942_v4 }
 0xc68   : > { %v3765_v7 = vpack.c.bf16 %v3944_v5, %v3943_v6  ;;  %v4043_v8 = vpop.eup %4042 }
 0xc69   : > { %v2026_v11 = vmul.f32 %v4043_v8, %v4039_v62 }
 0xc6a   : > { %3767 = vmatprep.subr.msk.bf16.mxu1 %vm4540_vm3, %v3765_v7 }
 0xc6c   : > { %v4045_v9 = vpop.eup %4044 }
 0xc6d   : > { %v2025_v10 = vmul.f32 %v4045_v9, %v4041_v0 }
 0xc6f   : > { %3610 = vmatprep.mubr.msk.f32.mxu1 %vm942_vm6, %v2025_v10 }
 0xc70   : > { %3611 = vmatmul.mubr.msk.f32.vlgmr.msra.gmra.mrb[12].mxu1 %vm942_vm6, %v2026_v11 }
 0xc71   : > { %3770 = vmatpush3.bf16.xpose.msk.msra.mxu1 %vm4540_vm3, %v3765_v7  ;;  %3617 = vmatprep.mubr.msk.f32.mxu1 %vm854_vm2, %v2126_v19 }
 0xc78   : > { %3618 = vmatmul.mubr.msk.f32.vlgmr.msra.gmra.mrb[14].mxu1 %vm854_vm2, %v2128_v21 }
 0xd43   : > { %v4702_v22 = vpop.f32.mrb[12].mxu1 }
 0xd44   : > { %v4704_v23 = vpop.f32.mrb[13].mxu1 }
 0xd4b   : > { %v3619_v25 = vpop.f32.mrb[14].mxu1 }
 0xd4c   : > { %v2217_v26 = vmul.f32 0.35355338, %v3619_v25  ;;  %v2207_v27 = vpop.f32.mrb[15].mxu1 }
 0xd4d   : > { %v2216_v28 = vmul.f32 0.35355338, %v2207_v27 }
 0xd4e   : > { %v2219_v29 = vadd.f32 %v2217_v26, %v4550_v32 }
 0xd4f   : > { %v2218_v30 = vadd.f32 %v2216_v28, %v4552_v35 }
 0xd50   : > { %v2223_v31 = vsel %vm942_vm6, %v2219_v29, -inf }
 0xd51   : > { %2224 = vmax.xlane.f32.xlu1 %v2223_v31  ;;  %v2220_v33 = vsel %vm942_vm6, %v2218_v30, -inf }
 0xd52   : > { %2221 = vmax.xlane.f32.xlu0 %v2220_v33 }
 0xd62   : > { %3946 = vrot.lane.b32.xlu1 %v4535_v20, %s4226_s17 }
 0xd66   : > { %2340 = vrot.lane.b32.xlu1 %v4525_v14, %s4228_s30 }
 0xd6a   : > { %2342 = vrot.lane.b32.xlu1 %v4529_v16, %s4228_s30 }
 0xdde   : > { %v2225_v34 = vpop.xlane.xlu1 %2224 }
 0xddf   : > { %v2227_v36 = vsub.f32 %v2219_v29, %v2225_v34  ;;  %v2222_v37 = vpop.xlane.xlu0 %2221 }
 0xde0   : > { %v2226_v38 = vsub.f32 %v2218_v30, %v2222_v37 }
 0xde1   : > { %v2230_v39 = vmul.f32 1.442695, %v2227_v36 }
 0xde2   : > { %v2228_v42 = vmul.f32 1.442695, %v2226_v38  ;;  %v3947_v43 = vpop.permute.xlu1 %3946 }
 0xde3   : > { %4046 = vpow2.f32 %v2230_v39  ;;  %v3949_v44 = vunpack.i.h.bf16 %v3947_v43  ;;  %v3948_v45 = vunpack.i.l.bf16 %v3947_v43  ;;  %v3974_v39 = vld [vmem:[%s4468_s19] sm:$0xff]   ;;  %v3975_v43 = vld [vmem:[%s4468_s19 + $0x8] sm:$0xff]  }
 0xde4   : > { %4048 = vpow2.f32 %v2228_v42  ;;  %v4230_v42 = vmov 0.0  }
 0xde5   : > { %v3771_v46 = vpack.c.bf16 %v3949_v44, %v3948_v45  ;;  %v3976_v44 = vld [vmem:[%s4468_s19 + $0x10] sm:$0xff]   ;;  %v3977_v45 = vld [vmem:[%s4468_s19 + $0x18] sm:$0xff]  }
 0xde6   : > { %v2341_v61 = vpop.permute.xlu1 %2340 }
 0xde7   : > { %3772 = vmatprep.subr.bf16.mxu0 %v3771_v46 }
 0xde8   : > { %3774 = vmatpush3.bf16.msra.mxu0 %v3771_v46 }
 0xded   : > { %v4047_v47 = vpop.eup %4046 }
 0xdee   : > { %v2235_v14 = vsel %vm942_vm6, %v4047_v47, 0.0  ;;  %v4049_v48 = vpop.eup %4048 }
 0xdef   : > { %2236 = vadd.xlane.f32.xlu0 %v2235_v14  ;;  %v2232_v16 = vsel %vm942_vm6, %v4049_v48, 0.0 }
 0xdf3   : > { %2233 = vadd.xlane.f32.xlu0 %v2232_v16 }
 0xe09   : > { %3951 = vrot.lane.b32.xlu0 %v4533_v18, %s4229_s2  ;;  %v2343_v18 = vpop.permute.xlu1 %2342 }
 0xe7c   : > { %v2237_v49 = vpop.xlane.xlu0 %2236 }
 0xe7d   : > { %4050 = vrcp.f32 %v2237_v49 }
 0xe80   : > { %v2234_v50 = vpop.xlane.xlu0 %2233 }
 0xe81   : > { %4052 = vrcp.f32 %v2234_v50 }
 0xe84   : > { %v3952_v51 = vpop.permute.xlu0 %3951 }
 0xe85   : > { %v3954_v52 = vunpack.i.h.bf16 %v3952_v51  ;;  %v3953_v53 = vunpack.i.l.bf16 %v3952_v51  ;;  %v3978_v51 = vld [vmem:[%s4477_s23] sm:$0xff]  }
 0xe87   : > { %v3775_v54 = vpack.c.bf16 %v3954_v52, %v3953_v53  ;;  %v4051_v55 = vpop.eup %4050  ;;  %v3979_v52 = vld [vmem:[%s4477_s23 + $0x8] sm:$0xff]   ;;  %v3980_v53 = vld [vmem:[%s4477_s23 + $0x10] sm:$0xff]  }
 0xe88   : > { %v2241_v60 = vmul.f32 %v4051_v55, %v4047_v47  ;;  %v3982_v55 = vld [vmem:[%s4477_s23 + $0x20] sm:$0xff]  }
 0xe89   : > { %3777 = vmatprep.subr.msk.bf16.mxu0 %vm4540_vm3, %v3775_v54 }
 0xe8b   : > { %v4053_v56 = vpop.eup %4052 }
 0xe8c   : > { %v2240_v59 = vmul.f32 %v4053_v56, %v4049_v48  ;;  %v3983_v56 = vld [vmem:[%s4477_s23 + $0x28] sm:$0xff]  }
 0xe8e   : > { %3624 = vmatprep.mubr.msk.f32.mxu0 %vm942_vm6, %v2240_v59  ;;  %v3984_v59 = vld [vmem:[%s4477_s23 + $0x30] sm:$0xff]  }
 0xe8f   : > { %3625 = vmatmul.mubr.msk.f32.vlgmr.msra.gmra.mrb[14].mxu0 %vm942_vm6, %v2241_v60  ;;  %v3985_v60 = vld [vmem:[%s4477_s23 + $0x38] sm:$0xff]  }
 0xe90   : > { %3780 = vmatpush3.bf16.xpose.msk.msra.mxu0 %vm4540_vm3, %v3775_v54  ;;  %3631 = vmatprep.mubr.msk.f32.mxu0 %vm854_vm2, %v2341_v61  ;;  %v3981_v54 = vld [vmem:[%s4477_s23 + $0x18] sm:$0xff]   ;;  %v3386_v61 = vld [vmem:[%s5024_s0] ss:$0 sm:$0xff] }
 0xe91   : > { %3641 = vmatprep.subr.bf16.mxu0 %v4230_v42 }
 0xe97   : > { %3632 = vmatmul.mubr.msk.f32.vlgmr.msra.gmra.mrb[16].mxu0 %vm854_vm2, %v2343_v18 }
 0xe98   : > { %3642 = vmatpush3.bf16.msra.mxu0 %v3974_v39  ;;  %3649 = vmatprep.mubr.msk.bf16.mxu0 %vm4231_vm13, %v4230_v42  ;;  %v3989_v39 = vld [vmem:[%s4494_s25 + $0x18] sm:$0xff]  }
 0xe99   : > { %3643 = vmatprep.subr.bf16.mxu0 %v4230_v42 }
 0xe9c   : > { %3644 = vmatpush3.bf16.msra.mxu0 %v3975_v43 }
 0xe9d   : > { %3645 = vmatprep.subr.bf16.mxu0 %v4230_v42 }
 0xea0   : > { %3646 = vmatpush3.bf16.msra.mxu0 %v3976_v44 }
 0xea1   : > { %3647 = vmatprep.subr.bf16.mxu0 %v4230_v42 }
 0xea4   : > { %3648 = vmatpush3.bf16.msra.mxu0 %v3977_v45 }
 0xea5   : > { %3653 = vmatprep.subr.bf16.mxu0 %v4230_v42 }
 0xf62   : > { %v3626_v62 = vpop.f32.mrb[14].mxu0 }
 0xf63   : > { %v2320_v63 = vpop.f32.mrb[15].mxu0 }
 0xf6a   : > { %v3633_v0 = vpop.f32.mrb[16].mxu0 }
 0xf6b   : > { %v2432_v1 = vmul.f32 0.35355338, %v3633_v0  ;;  %v2422_v2 = vpop.f32.mrb[17].mxu0 }
 0xf6c   : > { %v2431_v3 = vmul.f32 0.35355338, %v2422_v2 }
 0xf6d   : > { %v2434_v4 = vadd.f32 %v2432_v1, %v4550_v32 }
 0xf6e   : > { %v2433_v5 = vadd.f32 %v2431_v3, %v4552_v35 }
 0xf6f   : > { %v2438_v6 = vsel %vm942_vm6, %v2434_v4, -inf }
 0xf70   : > { %2439 = vmax.xlane.f32.xlu1 %v2438_v6  ;;  %v2435_v24 = vsel %vm942_vm6, %v2433_v5, -inf }
 0xf71   : > { %2436 = vmax.xlane.f32.xlu0 %v2435_v24 }
 0xf81   : > { %3956 = vrot.lane.b32.xlu1 %v4535_v20, %s4228_s30 }
 0xf85   : > { %1258 = vrot.lane.b32.xlu1 %v4620_v12, %s4229_s2 }
 0xf89   : > { %1471 = vrot.lane.b32.xlu1 %v4626_v17, %s4227_s1 }
 0xf8d   : > { %1686 = vrot.lane.b32.xlu1 %v4652_v58, %s4225_s16 }
 0xf91   : > { %1901 = vrot.lane.b32.xlu1 %v4678_v41, %s4223_s27 }
 0xf95   : > { %2116 = vrot.lane.b32.xlu1 %v4704_v23, %s4220_s14 }
 0xf99   : > { %2331 = vrot.lane.b32.xlu1 %v2320_v63, %s4218_s24 }
 0xffd   : > { %v2440_v32 = vpop.xlane.xlu1 %2439 }
 0xffe   : > { %v2442_v35 = vsub.f32 %v2434_v4, %v2440_v32  ;;  %v2437_v20 = vpop.xlane.xlu0 %2436 }
 0xfff   : > { %v2441_v7 = vsub.f32 %v2433_v5, %v2437_v20 }
0x1000   : > { %v2445_v8 = vmul.f32 1.442695, %v2442_v35 }
0x1001   : > { %v2443_v12 = vmul.f32 1.442695, %v2441_v7  ;;  %v3957_v9 = vpop.permute.xlu1 %3956 }
0x1002   : > { %v3959_v10 = vunpack.i.h.bf16 %v3957_v9  ;;  %v3958_v17 = vunpack.i.l.bf16 %v3957_v9  ;;  %v3394_v9 = vld [vmem:[%s5025_s22] ss:$0 sm:$0xff] }
0x1003   : > { %4054 = vpow2.f32 %v2443_v12 }
0x1004   : > { %v3781_v58 = vpack.c.bf16 %v3959_v10, %v3958_v17  ;;  %4056 = vpow2.f32 %v2445_v8 }
0x1005   : > { %v1259_v11 = vpop.permute.xlu1 %1258 }
0x1006   : > { %1264 = vst.msk [vmem:[#allocation2 + $0x8] sm:$0xff] %vm1262_vm7, %v1259_v11  ;;  %3782 = vmatprep.subr.bf16.mxu1 %v3781_v58 }
0x1007   : > { %3784 = vmatpush3.bf16.msra.mxu1 %v3781_v58 }
0x1008   : > { %3673 = vmatprep.subr.bf16.mxu1 %v4230_v42 }
0x1009   : > { %v1472_v25 = vpop.permute.xlu1 %1471 }
0x100d   : > { %v4055_v41 = vpop.eup %4054  ;;  %v1687_v26 = vpop.permute.xlu1 %1686 }
0x100e   : > { %v2447_v19 = vsel %vm942_vm6, %v4055_v41, 0.0  ;;  %v4057_v21 = vpop.eup %4056 }
0x100f   : > { %2448 = vadd.xlane.f32.xlu0 %v2447_v19  ;;  %v2450_v23 = vsel %vm942_vm6, %v4057_v21, 0.0 }
0x1011   : > { %v1902_v28 = vpop.permute.xlu1 %1901 }
0x1013   : > { %2451 = vadd.xlane.f32.xlu0 %v2450_v23 }
0x1015   : > { %v2117_v29 = vpop.permute.xlu1 %2116 }
0x1019   : > { %v2332_v30 = vpop.permute.xlu1 %2331 }
0x1029   : > { %1256 = vrot.lane.b32.xlu0 %v4622_v13, %s4229_s2 }
0x102d   : > { %1473 = vrot.lane.b32.xlu0 %v4624_v15, %s4227_s1 }
0x1031   : > { %1688 = vrot.lane.b32.xlu0 %v4650_v57, %s4225_s16 }
0x1035   : > { %1903 = vrot.lane.b32.xlu0 %v4676_v40, %s4223_s27 }
0x1039   : > { %2118 = vrot.lane.b32.xlu0 %v4702_v22, %s4220_s14  ;;  %s5026_s14 = sld [smem:[#allocation28_spill]] }
0x103d   : > { %2333 = vrot.lane.b32.xlu0 %v3626_v62, %s4218_s24 }
0x103f   : > { %s5027_s29 = scalar_lea.vmem %s5026_s14, %s4451_s28 }
0x109c   : > { %v2449_v27 = vpop.xlane.xlu0 %2448 }
0x109d   : > { %4058 = vrcp.f32 %v2449_v27 }
0x10a0   : > { %v2452_v13 = vpop.xlane.xlu0 %2451 }
0x10a1   : > { %4060 = vrcp.f32 %v2452_v13 }
0x10a4   : > { %v1257_v15 = vpop.permute.xlu0 %1256 }
0x10a5   : > { %1263 = vst.msk [vmem:[#allocation2] sm:$0xff] %vm1262_vm7, %v1257_v15 }
0x10a6   : > { %1478 = vst.msk [vmem:[#allocation2] sm:$0xff] %vm1477_vm8, %v1472_v25 }
0x10a7   : > { %v4059_v57 = vpop.eup %4058  ;;  %1693 = vst.msk [vmem:[#allocation2] sm:$0xff] %vm1692_vm9, %v1687_v26  ;;  %v4075_v26 = vld [vmem:[%s4509_s20 + $0x8] sm:$0xff] }
0x10a8   : > { %v1474_v40 = vpop.permute.xlu0 %1473  ;;  %v2455_v22 = vmul.f32 %v4059_v57, %v4055_v41  ;;  %1908 = vst.msk [vmem:[#allocation2] sm:$0xff] %vm1907_vm10, %v1902_v28 }
0x10a9   : > { %1479 = vst.msk [vmem:[#allocation2 + $0x8] sm:$0xff] %vm1477_vm8, %v1474_v40 }
0x10aa   : > { %2123 = vst.msk [vmem:[#allocation2] sm:$0xff] %vm2122_vm11, %v2117_v29  ;;  %3638 = vmatprep.mubr.msk.f32.mxu1 %vm942_vm6, %v2455_v22 }
0x10ab   : > { %2338 = vst.msk [vmem:[#allocation2] sm:$0xff] %vm2337_vm12, %v2332_v30  ;;  %v4061_v31 = vpop.eup %4060 }
0x10ac   : > { %v2456_v33 = vmul.f32 %v4061_v31, %v4057_v21  ;;  %v1689_v34 = vpop.permute.xlu0 %1688  ;;  %v4074_v21 = vld [vmem:[%s4509_s20] sm:$0xff] }
0x10ad   : > { %1694 = vst.msk [vmem:[#allocation2 + $0x8] sm:$0xff] %vm1692_vm9, %v1689_v34 }
0x10ae   : > { %3639 = vmatmul.mubr.msk.f32.vlgmr.msra.gmra.mrb[16].mxu1 %vm942_vm6, %v2456_v33 }
0x10af   : > { %3681 = vmatprep.mubr.msk.bf16.mxu1 %vm4231_vm13, %v4230_v42 }
0x10b0   : > { %v1904_v36 = vpop.permute.xlu0 %1903 }
0x10b1   : > { %1909 = vst.msk [vmem:[#allocation2 + $0x8] sm:$0xff] %vm1907_vm10, %v1904_v36  ;;  %v3986_v36 = vld [vmem:[%s4494_s25] sm:$0xff]  }
0x10b2   : > { %3674 = vmatpush3.bf16.msra.mxu1 %v3986_v36 }
0x10b3   : > { %3675 = vmatprep.subr.bf16.mxu1 %v4230_v42 }
0x10b4   : > { %v2119_v37 = vpop.permute.xlu0 %2118 }
0x10b5   : > { %2124 = vst.msk [vmem:[#allocation2 + $0x8] sm:$0xff] %vm2122_vm11, %v2119_v37  ;;  %v3987_v37 = vld [vmem:[%s4494_s25 + $0x8] sm:$0xff]  }
0x10b6   : > { %3676 = vmatpush3.bf16.msra.mxu1 %v3987_v37 }
0x10b7   : > { %3677 = vmatprep.subr.bf16.mxu1 %v4230_v42 }
0x10b8   : > { %v2334_v38 = vpop.permute.xlu0 %2333 }
0x10b9   : > { %2339 = vst.msk [vmem:[#allocation2 + $0x8] sm:$0xff] %vm2337_vm12, %v2334_v38  ;;  %v3988_v38 = vld [vmem:[%s4494_s25 + $0x10] sm:$0xff]  }
0x10ba   : > { %3678 = vmatpush3.bf16.msra.mxu1 %v3988_v38 }
0x10bb   : > { %3679 = vmatprep.subr.bf16.mxu1 %v4230_v42 }
0x10be   : > { %3680 = vmatpush3.bf16.msra.mxu1 %v3989_v39 }
0x10bf   : > { %3685 = vmatprep.subr.bf16.mxu1 %v4230_v42 }
0x1181   : > { %v3640_v46 = vpop.f32.mrb[16].mxu1 }
0x1182   : > { %2548 = vrot.lane.b32.xlu0 %v3640_v46, %s4216_s5  ;;  %v2535_v47 = vpop.f32.mrb[17].mxu1 }
0x1183   : > { %2546 = vrot.lane.b32.xlu1 %v2535_v47, %s4216_s5 }
0x11f4   : > { %v2549_v14 = vpop.permute.xlu0 %2548 }
0x11f5   : > { %2554 = vst.msk [vmem:[#allocation2 + $0x8] sm:$0xff] %vm2552_vm14, %v2549_v14  ;;  %v2547_v48 = vpop.permute.xlu1 %2546 }
0x11f6   : > { %2553 = vst.msk [vmem:[#allocation2] sm:$0xff] %vm2552_vm14, %v2547_v48 }
0x11fc   : > { %v2556_v16 = vld [vmem:[#allocation2 + $0x8] sm:$0xff] }
0x11fd   : > { %v2555_v49 = vld [vmem:[#allocation2] sm:$0xff] }
0x11fe   : > { %v2557_v50 = vpack.c.bf16 %v2556_v16, %v2555_v49  ;;  %v3403_v16 = vld [vmem:[%s5027_s29] ss:$0 sm:$0xff] }
0x1200   : > { %3650 = vmatmul.mubr.msk.bf16.vlgmr.msra.gmra.mrb[20].mxu0 %vm801_vm1, %v2557_v50 }
0x1201   : > { %3669 = vmatprep.mubr.msk.bf16.mxu0 %vm4231_vm13, %v4230_v42  ;;  %3654 = vmatpush3.bf16.msra.mxu0 %v3978_v51 }
0x1202   : > { %3655 = vmatprep.subr.bf16.mxu0 %v4230_v42 }
0x1205   : > { %3656 = vmatpush3.bf16.msra.mxu0 %v3979_v52 }
0x1206   : > { %3657 = vmatprep.subr.bf16.mxu0 %v4230_v42 }
0x1209   : > { %3658 = vmatpush3.bf16.msra.mxu0 %v3980_v53  ;;  %v3404_v53 = vld [vmem:[%s712_s3] ss:$0 sm:$0xff]  ;;  %s5028_s3 = sld [smem:[#allocation22_spill]] }
0x120a   : > { %3659 = vmatprep.subr.bf16.mxu0 %v4230_v42 }
0x120d   : > { %3660 = vmatpush3.bf16.msra.mxu0 %v3981_v54 }
0x120e   : > { %3661 = vmatprep.subr.bf16.mxu0 %v4230_v42 }
0x1211   : > { %3662 = vmatpush3.bf16.msra.mxu0 %v3982_v55 }
0x1212   : > { %3663 = vmatprep.subr.bf16.mxu0 %v4230_v42 }
0x1215   : > { %3664 = vmatpush3.bf16.msra.mxu0 %v3983_v56 }
0x1216   : > { %3665 = vmatprep.subr.bf16.mxu0 %v4230_v42 }
0x1219   : > { %3666 = vmatpush3.bf16.msra.mxu0 %v3984_v59  ;;  %v3990_v59 = vld [vmem:[%s4503_s15] sm:$0xff]  }
0x121a   : > { %3667 = vmatprep.subr.bf16.mxu0 %v4230_v42 }
0x121d   : > { %3668 = vmatpush3.bf16.msra.mxu0 %v3985_v60 }
0x12d3   : > { %v2634_v18 = vpop.f32.mrb[20].mxu0 }
0x12d4   : > { %v2635_v62 = vadd.f32 %v3386_v61, %v2634_v18  ;;  %v3651_v63 = vpop.f32.mrb[21].mxu0  ;;  %v3992_v18 = vld [vmem:[%s4503_s15 + $0x10] sm:$0xff]  }
0x12d5   : > { %v2637_v0 = vpop.f32.mrb[22].mxu0  ;;  %v3994_v63 = vld [vmem:[%s4503_s15 + $0x20] sm:$0xff]  }
0x12d6   : > { %v3392_v1 = vmul.f32 -1.442695, %v2635_v62  ;;  %v2638_v2 = vadd.f32 %v3386_v61, %v2637_v0  ;;  %v3652_v3 = vpop.f32.mrb[23].mxu0  ;;  %v3991_v61 = vld [vmem:[%s4503_s15 + $0x8] sm:$0xff]  }
0x12d7   : > { %v3995_v0 = vld [vmem:[%s4503_s15 + $0x28] sm:$0xff]   ;;  %v741_v3 = vld [vmem:[%s5028_s3] sm:$0xff] }
0x12d8   : > { %4062 = vpow2.f32 %v3392_v1  ;;  %v3393_v4 = vmul.f32 -1.442695, %v2638_v2  ;;  %v3996_v1 = vld [vmem:[%s4503_s15 + $0x30] sm:$0xff]  }
0x12da   : > { %4064 = vpow2.f32 %v3393_v4  ;;  %v742_v4 = vld [vmem:[%s5028_s3 + $0x8] sm:$0xff] }
0x12e2   : > { %v4063_v5 = vpop.eup %4062 }
0x12e3   : > { %v2647_v6 = vadd.f32 1.0, %v4063_v5  ;;  %v3405_v5 = vld [vmem:[%s720_s11] ss:$0 sm:$0xff] }
0x12e4   : > { %v4065_v24 = vpop.eup %4064 }
0x12e5   : > { %4066 = vrcp.f32 %v2647_v6  ;;  %v2648_v32 = vadd.f32 1.0, %v4065_v24 }
0x12e7   : > { %4068 = vrcp.f32 %v2648_v32 }
0x12ef   : > { %v4067_v35 = vpop.eup %4066 }
0x12f0   : > { %v2653_v7 = vmul.f32 %v4067_v35, %v2635_v62  ;;  %v3993_v62 = vld [vmem:[%s4503_s15 + $0x18] sm:$0xff]  }
0x12f1   : > { %v4069_v20 = vpop.eup %4068 }
0x12f2   : > { %v2654_v8 = vmul.f32 %v4069_v20, %v2638_v2  ;;  %v3997_v2 = vld [vmem:[%s4503_s15 + $0x38] sm:$0xff]  }
0x12f4   : > { %v2655_v12 = vpack.c.bf16 %v2654_v8, %v2653_v7 }
0x12f6   : > { %3670 = vmatmul.mubr.bf16.vlgmr.msra.gmra.mrb[24].mxu0 %v2655_v12 }
0x13c9   : > { %v2761_v10 = vpop.f32.mrb[24].mxu0 }
0x13ca   : > { %v2762_v17 = vadd.f32 %v3394_v9, %v2761_v10  ;;  %v3671_v58 = vpop.f32.mrb[25].mxu0 }
0x13cb   : > { %v2764_v11 = vpop.f32.mrb[26].mxu0 }
0x13cc   : > { %v2765_v41 = vadd.f32 %v3394_v9, %v2764_v11  ;;  %v3672_v19 = vpop.f32.mrb[27].mxu0  ;;  %v2768_v23 = vadd.f32 %v4074_v21, %v2762_v17  ;;  %v3411_v9 = vld [vmem:[%s728_s7] ss:$0 sm:$0xff] }
0x13ce   : > { %v2770_v25 = vsel %vm801_vm1, %v2768_v23, 0.0  ;;  %v2769_v27 = vadd.f32 %v4075_v26, %v2765_v41 }
0x13cf   : > { %2771 = vadd.xlane.f32.xlu1 %v2770_v25 }
0x13d0   : > { %v2773_v28 = vsel %vm801_vm1, %v2769_v27, 0.0 }
0x13d1   : > { %2774 = vadd.xlane.f32.xlu0 %v2773_v28 }
0x145c   : > { %v2772_v13 = vpop.xlane.xlu1 %2771 }
0x145d   : > { %v2777_v29 = vmul.f32 0.015625, %v2772_v13 }
0x145e   : > { %v2775_v15 = vpop.xlane.xlu0 %2774 }
0x145f   : > { %v2779_v57 = vsub.f32 %v2768_v23, %v2777_v29  ;;  %v2778_v40 = vmul.f32 0.015625, %v2775_v15 }
0x1461   : > { %v2780_v22 = vsub.f32 %v2769_v27, %v2778_v40  ;;  %v2781_v30 = vmul.f32 %v2779_v57, %v2779_v57 }
0x1463   : > { %v2783_v31 = vsel %vm801_vm1, %v2781_v30, 0.0  ;;  %v2782_v33 = vmul.f32 %v2780_v22, %v2780_v22 }
0x1464   : > { %2784 = vadd.xlane.f32.xlu0 %v2783_v31 }
0x1465   : > { %v2786_v34 = vsel %vm801_vm1, %v2782_v33, 0.0 }
0x1466   : > { %2787 = vadd.xlane.f32.xlu1 %v2786_v34 }
0x1477   : > { %3021 = vperm.xlu1 %3961, %v742_v4  }
0x147a   : > { %3016 = vperm.xlu0 %3960, %v741_v3  }
0x14f1   : > { %v2785_v43 = vpop.xlane.xlu0 %2784 }
0x14f2   : > { %v2789_v44 = vmul.f32 0.015625, %v2785_v43 }
0x14f3   : > { %v2788_v45 = vpop.xlane.xlu1 %2787 }
0x14f4   : > { %v2791_v46 = vadd.f32 1e-08, %v2789_v44  ;;  %v2790_v47 = vmul.f32 0.015625, %v2788_v45 }
0x14f6   : > { %4070 = vrsqrt.f32 %v2791_v46  ;;  %v2792_v14 = vadd.f32 1e-08, %v2790_v47 }
0x14f7   : > { %v3022_v19 = vpop.permute.xlu1 %3021 }
0x14f8   : > { %4072 = vrsqrt.f32 %v2792_v14 }
0x14f9   : > { %v3017_v17 = vpop.permute.xlu0 %3016 }
0x1500   : > { %v4071_v48 = vpop.eup %4070 }
0x1501   : > { %v2795_v49 = vmul.f32 %v4071_v48, %v2779_v57 }
0x1502   : > { %v4073_v50 = vpop.eup %4072 }
0x1503   : > { %v2804_v51 = vmul.f32 %v3403_v16, %v2795_v49  ;;  %v2796_v52 = vmul.f32 %v4073_v50, %v2780_v22 }
0x1505   : > { %v2805_v54 = vmul.f32 %v3403_v16, %v2796_v52  ;;  %v2813_v55 = vadd.f32 %v3404_v53, %v2804_v51 }
0x1507   : > { %v2814_v56 = vadd.f32 %v3404_v53, %v2805_v54 }
0x1509   : > { %v2815_v60 = vpack.c.bf16 %v2814_v56, %v2813_v55 }
0x150b   : > { %3682 = vmatmul.mubr.msk.bf16.vlgmr.msra.gmra.mrb[20].mxu1 %vm801_vm1, %v2815_v60 }
0x150c   : > { %3686 = vmatpush3.bf16.msra.mxu1 %v3990_v59  ;;  %3701 = vmatprep.mubr.msk.bf16.mxu1 %vm4231_vm13, %v4230_v42 }
0x150d   : > { %3687 = vmatprep.subr.bf16.mxu1 %v4230_v42 }
0x1510   : > { %3688 = vmatpush3.bf16.msra.mxu1 %v3991_v61 }
0x1511   : > { %3689 = vmatprep.subr.bf16.mxu1 %v4230_v42 }
0x1514   : > { %3690 = vmatpush3.bf16.msra.mxu1 %v3992_v18 }
0x1515   : > { %3691 = vmatprep.subr.bf16.mxu1 %v4230_v42 }
0x1518   : > { %3692 = vmatpush3.bf16.msra.mxu1 %v3993_v62 }
0x1519   : > { %3693 = vmatprep.subr.bf16.mxu1 %v4230_v42 }
0x151c   : > { %3694 = vmatpush3.bf16.msra.mxu1 %v3994_v63 }
0x151d   : > { %3695 = vmatprep.subr.bf16.mxu1 %v4230_v42 }
0x1520   : > { %3696 = vmatpush3.bf16.msra.mxu1 %v3995_v0 }
0x1521   : > { %3697 = vmatprep.subr.bf16.mxu1 %v4230_v42 }
0x1524   : > { %3698 = vmatpush3.bf16.msra.mxu1 %v3996_v1 }
0x1525   : > { %3699 = vmatprep.subr.bf16.mxu1 %v4230_v42 }
0x1528   : > { %3700 = vmatpush3.bf16.msra.mxu1 %v3997_v2 }
0x15de   : > { %v2892_v6 = vpop.f32.mrb[20].mxu1 }
0x15df   : > { %v2893_v24 = vadd.f32 %v3405_v5, %v2892_v6  ;;  %v3683_v32 = vpop.f32.mrb[21].mxu1 }
0x15e0   : > { %v2895_v35 = vpop.f32.mrb[22].mxu1 }
0x15e1   : > { %v2896_v20 = vadd.f32 %v3405_v5, %v2895_v35  ;;  %v3684_v7 = vpop.f32.mrb[23].mxu1  ;;  %v2899_v8 = vmax.f32 %v2893_v24, 0.0 }
0x15e3   : > { %v2900_v42 = vmax.f32 %v2896_v20, 0.0 }
0x15e5   : > { %v2901_v12 = vpack.c.bf16 %v2900_v42, %v2899_v8 }
0x15e7   : > { %3702 = vmatmul.mubr.bf16.vlgmr.msra.gmra.mrb[24].mxu1 %v2901_v12 }
0x16b9   : > { %3029 = sbr.rel (%p3420_p0) target bundleno = 5826 (0x16c2), region = 92 }
0x16ba   : > { %v3007_v10 = vpop.f32.mrb[24].mxu1 }
0x16bb   : > { %v3008_v58 = vadd.f32 %v3411_v9, %v3007_v10  ;;  %v3703_v11 = vpop.f32.mrb[25].mxu1 }
0x16bc   : > { %v3010_v41 = vpop.f32.mrb[26].mxu1 }
0x16bd   : > { %v3011_v21 = vadd.f32 %v3411_v9, %v3010_v41  ;;  %v3024_v23 = vmul.f32 %v3017_v17, %v3008_v58  ;;  %v3704_v25 = vpop.f32.mrb[27].mxu1 }
0x16bf   : > { %v3025_v26 = vmul.f32 %v3022_v19, %v3011_v21  ;;  %3030 = vst.msk [vmem:[%s4509_s20] sm:$0xff] (!%p3420_p0), %vm801_vm1, %v3024_v23 }
0x16c1   : > { %3031 = vst.msk [vmem:[%s4509_s20 + $0x8] sm:$0xff] %vm801_vm1, %v3025_v26 }
0x16c2 PF: > { %p3421_p12 = scmp.ne.s32.totalorder %s4192_s21, 1 }
0x16c3   : > { %v3036_v27 = vsel (!%p3421_p12), %vm801_vm1, %v3024_v23, 0.0  ;;  %v3039_v28 = vsel (!%p3421_p12), %vm801_vm1, %v3025_v26, 0.0  ;;  %s5030_s28 = sld [smem:[#allocation31_spill]] (!%p3421_p12)  ;;  %s5031_s30 = sld [smem:[#allocation32_spill]] (!%p3421_p12) }
0x16c4   : > { %3035 = sbr.rel (%p3421_p12) target bundleno = 6145 (0x1801), region = 96  ;;  %3037 = vadd.xlane.f32.xlu0 (!%p3421_p12), %v3036_v27 }
0x16c8   : > { %3040 = vadd.xlane.f32.xlu0 (!%p3421_p12), %v3039_v28 }
0x16c9   : > { %v3422_v46 = vld [vmem:[%s5030_s28] ss:$0 sm:$0xff] (!%p3421_p12) }
0x16ca   : > { %v3423_v14 = vld [vmem:[%s5031_s30] ss:$0 sm:$0xff] (!%p3421_p12) }
0x1751   : > { %v3038_v13 = vpop.xlane.xlu0 %3037 }
0x1752   : > { %v3042_v29 = vmul.f32 0.015625, %v3038_v13 }
0x1754   : > { %v3044_v15 = vsub.f32 %v3024_v23, %v3042_v29 }
0x1755   : > { %v3041_v57 = vpop.xlane.xlu0 %3040 }
0x1756   : > { %v3043_v40 = vmul.f32 0.015625, %v3041_v57  ;;  %v3046_v22 = vmul.f32 %v3044_v15, %v3044_v15 }
0x1758   : > { %v3045_v30 = vsub.f32 %v3025_v26, %v3043_v40  ;;  %v3048_v31 = vsel %vm801_vm1, %v3046_v22, 0.0 }
0x1759   : > { %3049 = vadd.xlane.f32.xlu1 %v3048_v31 }
0x175a   : > { %v3047_v33 = vmul.f32 %v3045_v30, %v3045_v30 }
0x175c   : > { %v3051_v34 = vsel %vm801_vm1, %v3047_v33, 0.0 }
0x175d   : > { %3052 = vadd.xlane.f32.xlu1 %v3051_v34 }
0x17e6   : > { %v3050_v36 = vpop.xlane.xlu1 %3049 }
0x17e7   : > { %v3054_v37 = vmul.f32 0.015625, %v3050_v36 }
0x17e9   : > { %v3056_v38 = vadd.f32 1e-08, %v3054_v37 }
0x17ea   : > { %v3053_v39 = vpop.xlane.xlu1 %3052 }
0x17eb   : > { %4076 = vrsqrt.f32 %v3056_v38  ;;  %v3055_v43 = vmul.f32 0.015625, %v3053_v39 }
0x17ed   : > { %v3057_v44 = vadd.f32 1e-08, %v3055_v43 }
0x17ef   : > { %4078 = vrsqrt.f32 %v3057_v44 }
0x17f5   : > { %v4077_v45 = vpop.eup %4076 }
0x17f6   : > { %v3060_v47 = vmul.f32 %v4077_v45, %v3044_v15 }
0x17f8   : > { %v3069_v48 = vmul.f32 %v3422_v46, %v3060_v47 }
0x17f9   : > { %v4079_v16 = vpop.eup %4078 }
0x17fa   : > { %v3078_v49 = vadd.f32 %v3423_v14, %v3069_v48  ;;  %v3061_v50 = vmul.f32 %v4079_v16, %v3045_v30 }
0x17fc   : > { %3080 = vst.msk [vmem:[%s4509_s20] sm:$0xff] %vm801_vm1, %v3078_v49  ;;  %v3070_v51 = vmul.f32 %v3422_v46, %v3061_v50 }
0x17fe   : > { %v3079_v52 = vadd.f32 %v3423_v14, %v3070_v51 }
0x1800   : > { %3081 = vst.msk [vmem:[%s4509_s20 + $0x8] sm:$0xff] %vm801_vm1, %v3079_v52 }
0x1801 PF: > { %s5032_s19 = sld [smem:[#allocation12_spill]]  ;;  %s5033_s13 = sld [smem:[#allocation21_spill]] }
0x1802   : > { %s5034_s0 = sld [smem:[#allocation18_spill]]  ;;  %s5035_s24 = sld [smem:[#allocation33_spill]] }
0x1803   : > { %s3096_s29 = sshll.u32 %s4509_s20, 4  ;;  %s4232_s3 = smov [#allocation6]   ;;  %s4895_s29 = int_to_ptr.vmem [resolvable:$true] %s3096_s29 }
0x1804   : > { %s4110_s12 = scalar_lea.vmem %s4895_s29, 256  ;;  %s4114_s27 = sshll.u32 %s4232_s3, 4  ;;  %s4115_s27 = int_to_ptr.vmem [resolvable:$false] %s4114_s27 }
0x1805   : > { %p4111_p13 = scmp.ne.s32.totalorder %s4895_s29, %s4110_s12  ;;  %s4116_s18 = scalar_lea.vmem %s4115_s27, 512 }
0x1806   : > { %p4117_p7 = scmp.lt.s32.totalorder %s4895_s29, %s4115_s27  ;;  %p4118_p8 = scmp.lt.s32.totalorder %s4116_s18, %s4110_s12 }
0x1807   : > { %s3436_s23 = sshll.u32 %s5032_s19, 8  ;;  %s3083_s25 = scalar_lea.sflag [#allocation5], %s5033_s13 }
0x1808   : > { %s5036_s26 = smov %s5035_s24  ;;  %s4892_s14 = scalar_lea.hbm %s5035_s24, %s3436_s23 }
0x1809   : > { %p5037_p2 = scmp.ne.s32.totalorder %s5034_s0, 0  ;;  %p4119_p1 = por %p4118_p8, %p4117_p7 }
0x180b   : > { %p4112_p5 = pnand %p4111_p13, %p5037_p2 }
0x180d   : > { %p4113_p3 = pneg %p4112_p5 }
0x180f   : > { %p4120_p4 = pnand %p4119_p1, %p4113_p3 }
0x1811   : > { %4123 = shalt.err (!%p4120_p4)
}
0x1812   : > { %s4124_s20 = scalar_lea.hbm %s4892_s14, 256  ;;  %s4128_s17 = scalar_lea.hbm %s5036_s26, 512 }
0x1813   : > { %p4125_p6 = scmp.ne.s32.totalorder %s4892_s14, %s4124_s20  ;;  %p4129_p9 = scmp.lt.u32.totalorder %s4892_s14, %s5036_s26 }
0x1814   : > { %p4130_p0 = scmp.lt.u32.totalorder %s4128_s17, %s4124_s20  ;;  %p4132_p13 = scmp.lt.u32.totalorder %s4124_s20, %s4892_s14 }
0x1815   : > { %p4126_p10 = pnand %p4125_p6, %p5037_p2 }
0x1816   : > { %p4131_p12 = por %p4130_p0, %p4129_p9 }
0x1817   : > { %p4127_p11 = pneg %p4126_p10 }
0x1818   : > { %p4133_p5 = por %p4132_p13, %p4131_p12 }
0x181a   : > { %p4134_p3 = pnand %p4133_p5, %p4127_p11 }
0x181c   : > { %4137 = shalt.err (!%p4134_p3)
}
0x181d   : > { %s4233_s28 = smov 128  }
0x181e   : > { %3787 = dma.vmem_to_hbm [thread:$0]  (%p5037_p2), %s4895_s29, 256, %s4892_s14, %s3083_s25, %s4233_s28, %s4233_s28, %s4229_s2  }
0x181f PF: > { %s5038_s11 = sld [smem:[#allocation15_spill]]  ;;  %s5039_s1 = sld [smem:[#allocation9_spill]] }
0x1820   : > { %s5040_s30 = sld [smem:[#allocation19_spill]] }
0x1825   : > { %p3798_p7 = scmp.ge.s32.totalorder %s5038_s11, 2  ;;  %s3111_s19 = sand.u32 1, %s5039_s1  }
0x1826   : > { %p5041_p8 = scmp.ne.s32.totalorder %s5040_s30, 0  ;;  %s3112_s23 = scalar_lea.sflag [#allocation5], %s3111_s19 }
0x1828   : > { %p3794_p1 = pnand %p3798_p7, %p5041_p8 }
0x182a   : > { %4175 = dma.done.wait (!%p3794_p1), %s3112_s23, 256  }
0x182b   : > { %4177 = vsyncadd (!%p3794_p1), %s3112_s23, 4294967040  ;;  %s31_s25 = sadd.s32 1, %s5038_s11   ;;  %s5042_s18 = sld [smem:[#allocation10_spill]] }
0x182c   : > { %p28_p4 = scmp.ge.s32.totalorder %s31_s25, 6   ;;  %s5043_s19 = sld [smem:[#allocation11_spill]] }
0x182d   : > { %s5044_s20 = sld [smem:[#allocation20_spill]]  ;;  %s5045_s21 = sld [smem:[#allocation13_spill]] }
0x182e   : > { %s5046_s22 = sld [smem:[#allocation14_spill]]  ;;  %s5047_s23 = sld [smem:[#allocation16_spill]] }
0x182f   : > { %s5048_s24 = sld [smem:[#allocation17_spill]]  ;;  %30 = sbr.rel (!%p28_p4) target bundleno = 19 (0x13), region = 173 }
0x1836   :  { %3117 = vsyncpa [#allocation4], 1 }
0x1837   :  { %3119 = vsyncpa [#allocation4 + $0x1], 1 }
0x1838   :  { %3120 = vsyncpa [#allocation5], 1 }
0x1839   :  { %3122 = vsyncpa [#allocation5 + $0x1], 1 }

</bundles_post_ra>
